<compile_context>
chip_gen: v7x
topology: tpu7x:2x2x1
jax: 0.10.0
libtpu: 0.0.40
codegen_flags: <defaults>
</compile_context>

<pallas_src>
import functools

import jax
import jax.numpy as jnp
from jax.experimental import pallas as pl
from jax.experimental.pallas import tpu as pltpu


# Fused-head column layout inside the (D, 128) weight / (., 128) feature slab:
#   0:32    emodel embedding            (zi / zj)
#   32:35   face3d angle coeffs 224:227 (r_s / r_d)
#   35:38   face3d trans coeffs 254:257 (t_s / t_d)
#   38:40   gaze (pitch, yaw)           (g1 / g2)
#   40:104  arcface identity embedding  (esd / emod)
#   104:128 zero padding (lane-dense 128-wide slab)
_COL_EMO, _COL_ANG, _COL_TRA, _COL_GAZ, _COL_ARC, _COL_PAD = 0, 32, 35, 38, 40, 104

_EPS = 1e-8


def _cos_sim(a, b):
    # dot * rsqrt(max(||a||^2*||b||^2, eps^2)) == dot / max(||a||*||b||, eps).
    # rsqrt lowers to the EUP slot (effectively free next to the VPU/XLU work).
    num = jnp.sum(a * b, axis=1, keepdims=True)
    na2 = jnp.sum(a * a, axis=1, keepdims=True)
    nb2 = jnp.sum(b * b, axis=1, keepdims=True)
    return num * jax.lax.rsqrt(jnp.maximum(na2 * nb2, _EPS * _EPS))


def _row_l2(a, b):
    # TODO(synk): no epsilon inside sqrt (forward matches torch.norm exactly);
    #             a future backward pass would need an eps to avoid NaN at a==b.
    d = a - b
    return jnp.sqrt(jnp.sum(d * d, axis=1, keepdims=True))


def _vasa_loss_epilogue(f_ii, f_jj, f_sd, f_smod, *, batch_size, gaze_w,
                        emodel_w, face3d_w):
    """Loss reductions on VMEM-resident per-image feature rows.

    f_*: (B, 128) f32 feature slabs (one per input image). Returns a
    lane-dense (1, 128) f32 row with the four loss scalars in lanes 0..3.
    """
    B = batch_size
    zi = f_ii[:, _COL_EMO:_COL_ANG]
    zj = f_jj[:, _COL_EMO:_COL_ANG]
    # TODO(synk): the face3d branch is under torch.no_grad() in the original;
    #             forward values are identical, stop_gradient is omitted here.
    r_s = f_ii[:, _COL_ANG:_COL_TRA]
    t_s = f_ii[:, _COL_TRA:_COL_GAZ]
    r_d = f_jj[:, _COL_ANG:_COL_TRA]
    t_d = f_jj[:, _COL_TRA:_COL_GAZ]
    g1 = f_ii[:, _COL_GAZ:_COL_ARC]
    g2 = f_jj[:, _COL_GAZ:_COL_ARC]
    esd = f_sd[:, _COL_ARC:_COL_PAD]
    emod = f_smod[:, _COL_ARC:_COL_PAD]

    inv_b = 1.0 / float(B)

    # cosloss = F.cosine_embedding_loss(zi, zj, +1) / B * emodel_weight
    #   (mean reduction already divides by B; the PyTorch reference divides
    #    again explicitly -> net sum/B^2, reproduced here verbatim.)
    cosloss = jnp.mean(1.0 - _cos_sim(zi, zj), keepdims=True) * (inv_b * emodel_w)
    # arcloss = F.cosine_embedding_loss(esd, emod, -1): mean(max(cos, 0))
    arcloss = jnp.mean(jnp.maximum(_cos_sim(esd, emod), 0.0), keepdims=True)
    # rotation_loss = sum(||r_s-r_d|| + ||t_s-t_d||) / B * face3d_weight
    rotloss = jnp.sum(_row_l2(r_s, r_d) + _row_l2(t_s, t_d),
                      keepdims=True) * (inv_b * face3d_w)
    # gaze_loss = sum(||g1-g2||) / B * gaze_weight
    gazeloss = jnp.sum(_row_l2(g1, g2), keepdims=True) * (inv_b * gaze_w)

    # Single lane-dense (1, 128) row: lanes 0..3 hold the four loss terms.
    lane = jax.lax.broadcasted_iota(jnp.int32, (1, 128), 1)
    return jnp.where(lane == 0, arcloss,
           jnp.where(lane == 1, gazeloss,
           jnp.where(lane == 2, rotloss,
           jnp.where(lane == 3, cosloss, 0.0))))


# ----------------------------------------------------------------------------
# Kernel bodies
# ----------------------------------------------------------------------------
def _vasa_single_step_kernel(x_ii_ref, x_jj_ref, x_sd_ref, x_smod_ref, w_ref,
                             out_ref, *, batch_size, gaze_w, emodel_w,
                             face3d_w):
    """Small-D path: whole problem is VMEM-resident, one dot per image."""
    w = w_ref[...]                                             # (D, 128) bf16

    def head(x_ref):
        # f32 -> bf16 cast in-kernel (VPU); MXU dot accumulates in f32.
        return jnp.dot(x_ref[...].astype(jnp.bfloat16), w,
                       preferred_element_type=jnp.float32)     # (B, 128) f32

    out_ref[...] = _vasa_loss_epilogue(
        head(x_ii_ref), head(x_jj_ref), head(x_sd_ref), head(x_smod_ref),
        batch_size=batch_size, gaze_w=gaze_w, emodel_w=emodel_w,
        face3d_w=face3d_w)


def _vasa_kgrid_kernel(x_ii_ref, x_jj_ref, x_sd_ref, x_smod_ref, w_ref,
                       out_ref, acc_ref, *, batch_size, gaze_w, emodel_w,
                       face3d_w):
    """Production-sized-D path: K grid over the feature dim, f32 accumulator."""
    k = pl.program_id(0)

    @pl.when(k == 0)
    def _():
        acc_ref[...] = jnp.zeros_like(acc_ref)

    w = w_ref[...]                                             # (tk, 128) bf16
    for i, x_ref in enumerate((x_ii_ref, x_jj_ref, x_sd_ref, x_smod_ref)):
        acc_ref[i] += jnp.dot(x_ref[...].astype(jnp.bfloat16), w,
                              preferred_element_type=jnp.float32)

    @pl.when(k == pl.num_programs(0) - 1)
    def _():
        out_ref[...] = _vasa_loss_epilogue(
            acc_ref[0], acc_ref[1], acc_ref[2], acc_ref[3],
            batch_size=batch_size, gaze_w=gaze_w, emodel_w=emodel_w,
            face3d_w=face3d_w)


# ----------------------------------------------------------------------------
# pallas_call wrapper
# ----------------------------------------------------------------------------
def vasa_fused_forward(x_ii, x_jj, x_sd, x_smod, w_fused, *, batch_size,
                       gaze_w, emodel_w, face3d_w, single_step_max_d=8192,
                       tk_max=2048):
    """x_*: (B, D) f32; w_fused: (D, 128) bf16 -> (1, 128) f32 loss row."""
    B = batch_size
    D = w_fused.shape[0]
    kw = dict(batch_size=B, gaze_w=gaze_w, emodel_w=emodel_w,
              face3d_w=face3d_w)
    out_shape = jax.ShapeDtypeStruct((1, 128), jnp.float32)

    if D <= single_step_max_d:
        # Small D: footprint is tiny (< a few MB of VMEM); a single-step dot
        # avoids per-grid-step overhead and the init/finalize branches.
        return pl.pallas_call(
            functools.partial(_vasa_single_step_kernel, **kw),
            out_shape=out_shape,
            in_specs=[pl.BlockSpec(memory_space=pltpu.MemorySpace.VMEM)] * 5,
            out_specs=pl.BlockSpec(memory_space=pltpu.MemorySpace.VMEM),
        )(x_ii, x_jj, x_sd, x_smod, w_fused)

    # Production-sized D: K grid so only (tk,128) of W and 4x(B,tk) activation
    # tiles are VMEM-resident, double-buffered by BlockSpec.
    assert D % 128 == 0, "feature dim must be padded to a multiple of 128"
    tk = min(tk_max, D)
    tk -= tk % 128
    tk = max(tk, 128)
    while D % tk:
        tk -= 128
    nk = D // tk

    x_spec = pl.BlockSpec((B, tk), lambda k: (0, k))
    w_spec = pl.BlockSpec((tk, 128), lambda k: (k, 0))
    out_spec = pl.BlockSpec((1, 128), lambda k: (0, 0))

    # Double-buffered per-step footprint: W bf16 + 4 activation f32 tiles +
    # f32 accumulator (+ headroom).  Clamp <= 48 MiB so a v6e-tuned size can
    # never blow v7x's 64 MiB physical VMEM; floor at 32 MiB (above v5e's
    # 16 MiB scoped default so the 2K-range tiles still double-buffer there).
    need = 2 * (tk * 128 * 2 + 4 * B * tk * 4) + 4 * max(B, 8) * 128 * 4
    vmem_limit = int(min(max(need + (4 << 20), 32 << 20), 48 << 20))

    return pl.pallas_call(
        functools.partial(_vasa_kgrid_kernel, **kw),
        out_shape=out_shape,
        grid_spec=pltpu.PrefetchScalarGridSpec(
            num_scalar_prefetch=0,
            grid=(nk,),
            in_specs=[x_spec, x_spec, x_spec, x_spec, w_spec],
            out_specs=out_spec,
            scratch_shapes=[pltpu.VMEM((4, B, 128), jnp.float32)],
        ),
        compiler_params=pltpu.CompilerParams(
            dimension_semantics=("arbitrary",),
            vmem_limit_bytes=vmem_limit,
        ),
    )(x_ii, x_jj, x_sd, x_smod, w_fused)


# ----------------------------------------------------------------------------
# VasaLoss wrapper (glue: flatten, fused synthetic sub-model weights)
# ----------------------------------------------------------------------------
class VasaLossJAX:

    def __init__(self, config, img_shape, key, *, single_step_max_d=8192,
                 tk_max=2048):
        C, H, W = img_shape
        D = C * H * W
        self.D = D
        self.D_pad = ((D + 127) // 128) * 128
        self.single_step_max_d = single_step_max_d
        self.tk_max = tk_max

        w = config["weights"]["vasa"]
        self.gaze_weight = float(w["gaze"])
        self.emodel_weight = float(w["emodel"])
        self.face3d_weight = float(w["face3d"])
        # arcface_weight exists in the PyTorch module but is never applied in
        # forward(); mirrored here (unused).
        self.arcface_weight = float(w["arcface"])

        k1, k2, k3, k4 = jax.random.split(key, 4)
        scale = 0.02
        W_emodel = scale * jax.random.normal(k1, (D, 32), jnp.float32)
        W_face3d = scale * jax.random.normal(k2, (D, 257), jnp.float32)
        W_gaze = scale * jax.random.normal(k3, (D, 2), jnp.float32)
        W_arcface = scale * jax.random.normal(k4, (D, 64), jnp.float32)

        # split_coeff: angle = coeffs[:, 224:227], trans = coeffs[:, 254:257];
        # the other 251 face3d columns are never consumed -> drop them.
        W_face3d_rt = jnp.concatenate(
            [W_face3d[:, 224:227], W_face3d[:, 254:257]], axis=1)    # (D, 6)

        fused = jnp.concatenate(
            [W_emodel, W_face3d_rt, W_gaze, W_arcface], axis=1)       # (D, 104)
        fused = jnp.pad(fused,
                        ((0, self.D_pad - D), (0, 128 - fused.shape[1])))
        # bf16 weights: MXU-native, halves the dominant weight DMA stream.
        self.W_fused = fused.astype(jnp.bfloat16)                     # (D_pad, 128)

    def _flatten(self, x):
        # NCHW -> (B, C*H*W) row-major (matches torch .view); reshape is free.
        xf = x.reshape(x.shape[0], -1)
        if self.D_pad != self.D:
            # TODO(synk): only hit when C*H*W is not a multiple of 128; costs
            #             one extra wrapper-side copy for the zero pad.
            xf = jnp.pad(xf, ((0, 0), (0, self.D_pad - self.D)))
        return xf

    def __call__(self, giiij, gjjij, gsd, gsmod):
        B = giiij.shape[0]
        out = vasa_fused_forward(
            self._flatten(giiij), self._flatten(gjjij),
            self._flatten(gsd), self._flatten(gsmod),
            self.W_fused,
            batch_size=B,
            gaze_w=self.gaze_weight,
            emodel_w=self.emodel_weight,
            face3d_w=self.face3d_weight,
            single_step_max_d=self.single_step_max_d,
            tk_max=self.tk_max,
        )
        arcloss = out[0, 0]
        gaze_loss = out[0, 1]
        rotation_loss = out[0, 2]
        cosloss = out[0, 3]
        total = arcloss + gaze_loss + rotation_loss + cosloss
        return total, {
            "arcloss": arcloss,
            "gazeloss": gaze_loss,
            "rotationloss": rotation_loss,
            "cosloss": cosloss,
        }

    # Pure-JAX reference (same bf16-rounded matmul inputs, f32 accumulation).
    def reference(self, giiij, gjjij, gsd, gsmod):
        B = giiij.shape[0]
        Wf = self.W_fused.astype(jnp.float32)

        def head(x):
            xb = self._flatten(x).astype(jnp.bfloat16).astype(jnp.float32)
            return jnp.dot(xb, Wf)

        f_ii, f_jj, f_sd, f_smod = head(giiij), head(gjjij), head(gsd), head(gsmod)
        zi, zj = f_ii[:, 0:32], f_jj[:, 0:32]
        r_s, t_s = f_ii[:, 32:35], f_ii[:, 35:38]
        r_d, t_d = f_jj[:, 32:35], f_jj[:, 35:38]
        g1, g2 = f_ii[:, 38:40], f_jj[:, 38:40]
        esd, emod = f_sd[:, 40:104], f_smod[:, 40:104]

        def cos(a, b):
            return jnp.sum(a * b, axis=1) / jnp.maximum(
                jnp.linalg.norm(a, axis=1) * jnp.linalg.norm(b, axis=1), 1e-8)

        cosloss = jnp.mean(1.0 - cos(zi, zj)) / B * self.emodel_weight
        arcloss = jnp.mean(jnp.maximum(cos(esd, emod), 0.0))
        rotloss = jnp.sum(jnp.linalg.norm(r_s - r_d, axis=1)
                          + jnp.linalg.norm(t_s - t_d, axis=1)) / B * self.face3d_weight
        gazeloss = jnp.sum(jnp.linalg.norm(g1 - g2, axis=1)) / B * self.gaze_weight
        total = arcloss + gazeloss + rotloss + cosloss
        return total, {"arcloss": arcloss, "gazeloss": gazeloss,
                       "rotationloss": rotloss, "cosloss": cosloss}


# ----------------------------------------------------------------------------
if __name__ == "__main__":
    config = {
        "weights": {
            "vasa": {"gaze": 0.5, "arcface": 0.25, "emodel": 2.0, "face3d": 1.0}
        }
    }

    B, C, H, W = 2, 4, 16, 16
    key = jax.random.PRNGKey(0)
    k_mod, k_a, k_b, k_c, k_d = jax.random.split(key, 5)

    giiij = jax.random.normal(k_a, (B, C, H, W), jnp.float32)
    gjjij = jax.random.normal(k_b, (B, C, H, W), jnp.float32)
    gsd = jax.random.normal(k_c, (B, C, H, W), jnp.float32)
    gsmod = jax.random.normal(k_d, (B, C, H, W), jnp.float32)

    # Small-D path: gridless single fused dot.
    loss_small = VasaLossJAX(config, (C, H, W), k_mod)
    total, parts = jax.jit(loss_small.__call__)(giiij, gjjij, gsd, gsmod)
    jax.block_until_ready(total)

    # K-grid (production-sized-D) code path, exercised here at the demo size
    # by forcing the threshold down (tk=256 -> 4 K-steps over D=1024).
    loss_grid = VasaLossJAX(config, (C, H, W), k_mod,
                            single_step_max_d=0, tk_max=256)
    total_g, parts_g = jax.jit(loss_grid.__call__)(giiij, gjjij, gsd, gsmod)
    jax.block_until_ready(total_g)

    # Validate both paths against the pure-JAX reference.
    total_ref, parts_ref = loss_small.reference(giiij, gjjij, gsd, gsmod)

    def close(a, b, tol=2e-2):
        a, b = float(a), float(b)
        return abs(a - b) <= tol * max(1.0, abs(a), abs(b))

    assert close(total, total_ref), (float(total), float(total_ref))
    assert close(total_g, total_ref), (float(total_g), float(total_ref))
    for name in ("arcloss", "gazeloss", "rotationloss", "cosloss"):
        assert close(parts[name], parts_ref[name]), name
        assert close(parts_g[name], parts_ref[name]), name

    print("KERNEL_OK")
</pallas_src>

<mosaic_0001>
module attributes {stable_mosaic.version = 11 : i64} {
  func.func @_vasa_single_step_kernel(%arg0: memref<2x1024xf32, #tpu.memory_space<vmem>>, %arg1: memref<2x1024xf32, #tpu.memory_space<vmem>>, %arg2: memref<2x1024xf32, #tpu.memory_space<vmem>>, %arg3: memref<2x1024xf32, #tpu.memory_space<vmem>>, %arg4: memref<1024x128xbf16, #tpu.memory_space<vmem>>, %arg5: memref<1x128xf32, #tpu.memory_space<vmem>>) attributes {dimension_semantics = [], scalar_prefetch = 0 : i64, scratch_operands = 0 : i64, tpu.core_type = #tpu.core_type<tc>} {
    %c0 = arith.constant 0 : index
    %c0_0 = arith.constant 0 : index
    %0 = vector.load %arg4[%c0, %c0_0] : memref<1024x128xbf16, #tpu.memory_space<vmem>>, vector<1024x128xbf16>
    %c0_1 = arith.constant 0 : index
    %c0_2 = arith.constant 0 : index
    %1 = vector.load %arg0[%c0_1, %c0_2] : memref<2x1024xf32, #tpu.memory_space<vmem>>, vector<2x1024xf32>
    %2 = arith.truncf %1 : vector<2x1024xf32> to vector<2x1024xbf16>
    %cst = arith.constant dense<0.000000e+00> : vector<2x128xf32>
    %3 = tpu.matmul %2, %0, %cst {dimension_numbers = #tpu.dot_dimension_numbers<[1], [0], [0], [1], [0, 0, 1, 1], [], []>} : vector<2x1024xbf16>, vector<1024x128xbf16>, vector<2x128xf32> -> vector<2x128xf32>
    %c0_3 = arith.constant 0 : index
    %c0_4 = arith.constant 0 : index
    %4 = vector.load %arg1[%c0_3, %c0_4] : memref<2x1024xf32, #tpu.memory_space<vmem>>, vector<2x1024xf32>
    %5 = arith.truncf %4 : vector<2x1024xf32> to vector<2x1024xbf16>
    %cst_5 = arith.constant dense<0.000000e+00> : vector<2x128xf32>
    %6 = tpu.matmul %5, %0, %cst_5 {dimension_numbers = #tpu.dot_dimension_numbers<[1], [0], [0], [1], [0, 0, 1, 1], [], []>} : vector<2x1024xbf16>, vector<1024x128xbf16>, vector<2x128xf32> -> vector<2x128xf32>
    %c0_6 = arith.constant 0 : index
    %c0_7 = arith.constant 0 : index
    %7 = vector.load %arg2[%c0_6, %c0_7] : memref<2x1024xf32, #tpu.memory_space<vmem>>, vector<2x1024xf32>
    %8 = arith.truncf %7 : vector<2x1024xf32> to vector<2x1024xbf16>
    %cst_8 = arith.constant dense<0.000000e+00> : vector<2x128xf32>
    %9 = tpu.matmul %8, %0, %cst_8 {dimension_numbers = #tpu.dot_dimension_numbers<[1], [0], [0], [1], [0, 0, 1, 1], [], []>} : vector<2x1024xbf16>, vector<1024x128xbf16>, vector<2x128xf32> -> vector<2x128xf32>
    %c0_9 = arith.constant 0 : index
    %c0_10 = arith.constant 0 : index
    %10 = vector.load %arg3[%c0_9, %c0_10] : memref<2x1024xf32, #tpu.memory_space<vmem>>, vector<2x1024xf32>
    %11 = arith.truncf %10 : vector<2x1024xf32> to vector<2x1024xbf16>
    %cst_11 = arith.constant dense<0.000000e+00> : vector<2x128xf32>
    %12 = tpu.matmul %11, %0, %cst_11 {dimension_numbers = #tpu.dot_dimension_numbers<[1], [0], [0], [1], [0, 0, 1, 1], [], []>} : vector<2x1024xbf16>, vector<1024x128xbf16>, vector<2x128xf32> -> vector<2x128xf32>
    %13 = vector.extract_strided_slice %3 {offsets = [0, 0], sizes = [2, 32], strides = [1, 1]} : vector<2x128xf32> to vector<2x32xf32>
    %14 = vector.extract_strided_slice %6 {offsets = [0, 0], sizes = [2, 32], strides = [1, 1]} : vector<2x128xf32> to vector<2x32xf32>
    %15 = vector.extract_strided_slice %3 {offsets = [0, 32], sizes = [2, 3], strides = [1, 1]} : vector<2x128xf32> to vector<2x3xf32>
    %16 = vector.extract_strided_slice %3 {offsets = [0, 35], sizes = [2, 3], strides = [1, 1]} : vector<2x128xf32> to vector<2x3xf32>
    %17 = vector.extract_strided_slice %6 {offsets = [0, 32], sizes = [2, 3], strides = [1, 1]} : vector<2x128xf32> to vector<2x3xf32>
    %18 = vector.extract_strided_slice %6 {offsets = [0, 35], sizes = [2, 3], strides = [1, 1]} : vector<2x128xf32> to vector<2x3xf32>
    %19 = vector.extract_strided_slice %3 {offsets = [0, 38], sizes = [2, 2], strides = [1, 1]} : vector<2x128xf32> to vector<2x2xf32>
    %20 = vector.extract_strided_slice %6 {offsets = [0, 38], sizes = [2, 2], strides = [1, 1]} : vector<2x128xf32> to vector<2x2xf32>
    %21 = vector.extract_strided_slice %9 {offsets = [0, 40], sizes = [2, 64], strides = [1, 1]} : vector<2x128xf32> to vector<2x64xf32>
    %22 = vector.extract_strided_slice %12 {offsets = [0, 40], sizes = [2, 64], strides = [1, 1]} : vector<2x128xf32> to vector<2x64xf32>
    %23 = arith.mulf %13, %14 : vector<2x32xf32>
    %cst_12 = arith.constant dense<0.000000e+00> : vector<2xf32>
    %24 = vector.multi_reduction <add>, %23, %cst_12 [1] : vector<2x32xf32> to vector<2xf32>
    %25 = vector.shape_cast %24 : vector<2xf32> to vector<2x1xf32>
    %26 = arith.mulf %13, %13 : vector<2x32xf32>
    %cst_13 = arith.constant dense<0.000000e+00> : vector<2xf32>
    %27 = vector.multi_reduction <add>, %26, %cst_13 [1] : vector<2x32xf32> to vector<2xf32>
    %28 = vector.shape_cast %27 : vector<2xf32> to vector<2x1xf32>
    %29 = arith.mulf %14, %14 : vector<2x32xf32>
    %cst_14 = arith.constant dense<0.000000e+00> : vector<2xf32>
    %30 = vector.multi_reduction <add>, %29, %cst_14 [1] : vector<2x32xf32> to vector<2xf32>
    %31 = vector.shape_cast %30 : vector<2xf32> to vector<2x1xf32>
    %32 = arith.mulf %28, %31 : vector<2x1xf32>
    %cst_15 = arith.constant 1.000000e-16 : f32
    %33 = vector.broadcast %cst_15 : f32 to vector<2x1xf32>
    %34 = arith.maximumf %32, %33 : vector<2x1xf32>
    %35 = math.rsqrt %34 : vector<2x1xf32>
    %36 = arith.mulf %25, %35 : vector<2x1xf32>
    %cst_16 = arith.constant 1.000000e+00 : f32
    %37 = vector.broadcast %cst_16 : f32 to vector<2x1xf32>
    %38 = arith.subf %37, %36 : vector<2x1xf32>
    %39 = vector.shape_cast %38 : vector<2x1xf32> to vector<1x2x1xf32>
    %cst_17 = arith.constant dense<0.000000e+00> : vector<1xf32>
    %40 = vector.multi_reduction <add>, %39, %cst_17 [1, 2] : vector<1x2x1xf32> to vector<1xf32>
    %41 = vector.shape_cast %40 : vector<1xf32> to vector<1x1x1xf32>
    %42 = vector.extract %41[0, 0, 0] : f32 from vector<1x1x1xf32>
    %43 = vector.broadcast %42 : f32 to vector<1x1xf32>
    %cst_18 = arith.constant 2.000000e+00 : f32
    %44 = vector.broadcast %cst_18 : f32 to vector<1x1xf32>
    %45 = arith.divf %43, %44 : vector<1x1xf32>
    %cst_19 = arith.constant 1.000000e+00 : f32
    %46 = vector.broadcast %cst_19 : f32 to vector<1x1xf32>
    %47 = arith.mulf %45, %46 : vector<1x1xf32>
    %48 = arith.mulf %21, %22 : vector<2x64xf32>
    %cst_20 = arith.constant dense<0.000000e+00> : vector<2xf32>
    %49 = vector.multi_reduction <add>, %48, %cst_20 [1] : vector<2x64xf32> to vector<2xf32>
    %50 = vector.shape_cast %49 : vector<2xf32> to vector<2x1xf32>
    %51 = arith.mulf %21, %21 : vector<2x64xf32>
    %cst_21 = arith.constant dense<0.000000e+00> : vector<2xf32>
    %52 = vector.multi_reduction <add>, %51, %cst_21 [1] : vector<2x64xf32> to vector<2xf32>
    %53 = vector.shape_cast %52 : vector<2xf32> to vector<2x1xf32>
    %54 = arith.mulf %22, %22 : vector<2x64xf32>
    %cst_22 = arith.constant dense<0.000000e+00> : vector<2xf32>
    %55 = vector.multi_reduction <add>, %54, %cst_22 [1] : vector<2x64xf32> to vector<2xf32>
    %56 = vector.shape_cast %55 : vector<2xf32> to vector<2x1xf32>
    %57 = arith.mulf %53, %56 : vector<2x1xf32>
    %cst_23 = arith.constant 1.000000e-16 : f32
    %58 = vector.broadcast %cst_23 : f32 to vector<2x1xf32>
    %59 = arith.maximumf %57, %58 : vector<2x1xf32>
    %60 = math.rsqrt %59 : vector<2x1xf32>
    %61 = arith.mulf %50, %60 : vector<2x1xf32>
    %cst_24 = arith.constant 0.000000e+00 : f32
    %62 = vector.broadcast %cst_24 : f32 to vector<2x1xf32>
    %63 = arith.maximumf %61, %62 : vector<2x1xf32>
    %64 = vector.shape_cast %63 : vector<2x1xf32> to vector<1x2x1xf32>
    %cst_25 = arith.constant dense<0.000000e+00> : vector<1xf32>
    %65 = vector.multi_reduction <add>, %64, %cst_25 [1, 2] : vector<1x2x1xf32> to vector<1xf32>
    %66 = vector.shape_cast %65 : vector<1xf32> to vector<1x1x1xf32>
    %67 = vector.extract %66[0, 0, 0] : f32 from vector<1x1x1xf32>
    %68 = vector.broadcast %67 : f32 to vector<1x1xf32>
    %cst_26 = arith.constant 2.000000e+00 : f32
    %69 = vector.broadcast %cst_26 : f32 to vector<1x1xf32>
    %70 = arith.divf %68, %69 : vector<1x1xf32>
    %71 = arith.subf %15, %17 : vector<2x3xf32>
    %72 = arith.mulf %71, %71 : vector<2x3xf32>
    %cst_27 = arith.constant dense<0.000000e+00> : vector<2xf32>
    %73 = vector.multi_reduction <add>, %72, %cst_27 [1] : vector<2x3xf32> to vector<2xf32>
    %74 = vector.shape_cast %73 : vector<2xf32> to vector<2x1xf32>
    %75 = math.sqrt %74 : vector<2x1xf32>
    %76 = arith.subf %16, %18 : vector<2x3xf32>
    %77 = arith.mulf %76, %76 : vector<2x3xf32>
    %cst_28 = arith.constant dense<0.000000e+00> : vector<2xf32>
    %78 = vector.multi_reduction <add>, %77, %cst_28 [1] : vector<2x3xf32> to vector<2xf32>
    %79 = vector.shape_cast %78 : vector<2xf32> to vector<2x1xf32>
    %80 = math.sqrt %79 : vector<2x1xf32>
    %81 = arith.addf %75, %80 : vector<2x1xf32>
    %82 = vector.shape_cast %81 : vector<2x1xf32> to vector<1x2x1xf32>
    %cst_29 = arith.constant dense<0.000000e+00> : vector<1xf32>
    %83 = vector.multi_reduction <add>, %82, %cst_29 [1, 2] : vector<1x2x1xf32> to vector<1xf32>
    %84 = vector.shape_cast %83 : vector<1xf32> to vector<1x1x1xf32>
    %85 = vector.extract %84[0, 0, 0] : f32 from vector<1x1x1xf32>
    %86 = vector.broadcast %85 : f32 to vector<1x1xf32>
    %cst_30 = arith.constant 5.000000e-01 : f32
    %87 = vector.broadcast %cst_30 : f32 to vector<1x1xf32>
    %88 = arith.mulf %86, %87 : vector<1x1xf32>
    %89 = arith.subf %19, %20 : vector<2x2xf32>
    %90 = arith.mulf %89, %89 : vector<2x2xf32>
    %cst_31 = arith.constant dense<0.000000e+00> : vector<2xf32>
    %91 = vector.multi_reduction <add>, %90, %cst_31 [1] : vector<2x2xf32> to vector<2xf32>
    %92 = vector.shape_cast %91 : vector<2xf32> to vector<2x1xf32>
    %93 = math.sqrt %92 : vector<2x1xf32>
    %94 = vector.shape_cast %93 : vector<2x1xf32> to vector<1x2x1xf32>
    %cst_32 = arith.constant dense<0.000000e+00> : vector<1xf32>
    %95 = vector.multi_reduction <add>, %94, %cst_32 [1, 2] : vector<1x2x1xf32> to vector<1xf32>
    %96 = vector.shape_cast %95 : vector<1xf32> to vector<1x1x1xf32>
    %97 = vector.extract %96[0, 0, 0] : f32 from vector<1x1x1xf32>
    %98 = vector.broadcast %97 : f32 to vector<1x1xf32>
    %cst_33 = arith.constant 2.500000e-01 : f32
    %99 = vector.broadcast %cst_33 : f32 to vector<1x1xf32>
    %100 = arith.mulf %98, %99 : vector<1x1xf32>
    %101 = tpu.iota {dimensions = array<i32: 1>} : vector<1x128xi32>
    %c0_i32 = arith.constant 0 : i32
    %102 = vector.broadcast %c0_i32 : i32 to vector<1x128xi32>
    %103 = arith.cmpi eq, %101, %102 : vector<1x128xi32>
    %c1_i32 = arith.constant 1 : i32
    %104 = vector.broadcast %c1_i32 : i32 to vector<1x128xi32>
    %105 = arith.cmpi eq, %101, %104 : vector<1x128xi32>
    %c2_i32 = arith.constant 2 : i32
    %106 = vector.broadcast %c2_i32 : i32 to vector<1x128xi32>
    %107 = arith.cmpi eq, %101, %106 : vector<1x128xi32>
    %c3_i32 = arith.constant 3 : i32
    %108 = vector.broadcast %c3_i32 : i32 to vector<1x128xi32>
    %109 = arith.cmpi eq, %101, %108 : vector<1x128xi32>
    %cst_34 = arith.constant 0.000000e+00 : f32
    %110 = vector.shape_cast %47 : vector<1x1xf32> to vector<1x1xf32>
    %111 = vector.broadcast %110 : vector<1x1xf32> to vector<1x128xf32>
    %112 = vector.broadcast %cst_34 : f32 to vector<1x128xf32>
    %113 = arith.select %109, %111, %112 : vector<1x128xi1>, vector<1x128xf32>
    %114 = vector.shape_cast %88 : vector<1x1xf32> to vector<1x1xf32>
    %115 = vector.broadcast %114 : vector<1x1xf32> to vector<1x128xf32>
    %116 = arith.select %107, %115, %113 : vector<1x128xi1>, vector<1x128xf32>
    %117 = vector.shape_cast %100 : vector<1x1xf32> to vector<1x1xf32>
    %118 = vector.broadcast %117 : vector<1x1xf32> to vector<1x128xf32>
    %119 = arith.select %105, %118, %116 : vector<1x128xi1>, vector<1x128xf32>
    %120 = vector.shape_cast %70 : vector<1x1xf32> to vector<1x1xf32>
    %121 = vector.broadcast %120 : vector<1x1xf32> to vector<1x128xf32>
    %122 = arith.select %103, %121, %119 : vector<1x128xi1>, vector<1x128xf32>
    %c0_35 = arith.constant 0 : index
    %c0_36 = arith.constant 0 : index
    %123 = vector.load %arg5[%c0_35, %c0_36] : memref<1x128xf32, #tpu.memory_space<vmem>>, vector<1x128xf32>
    tpu.vector_store %arg5[%c0_35, %c0_36], %122 {strides = array<i32>} : memref<1x128xf32, #tpu.memory_space<vmem>>, vector<1x128xf32>,
    return
  }
}

</mosaic_0001>

<bundles_post_ra>
// kernel: a_call__.1
= control target key start
LH: loop header
LB: loop body
LE: loop exit
PB: predicated region body
PF: predicated region fallthrough
CT: control target
= control target key end

     0   :  { %v2058_v22 = vmov 1983009808   ;;  %v2817_v24 = vlaneseq  ;;  %vm1390_vm0 = vcmask 254976   ;;  %s2060_s6 = smov 93   ;;  %s2061_s7 = smov 88   ;;  %vm1469_vm1 = vcmask 17408   ;;  %s2811_s4 = inlined_call_operand.vmem [shape: bf16[1024,128], index: 4, kind: input, shape index: {}]   ;;  %s2812_s0 = inlined_call_operand.vmem [shape: f32[2,1024], index: 0, kind: input, shape index: {}]   ;;  %s2813_s1 = inlined_call_operand.vmem [shape: f32[2,1024], index: 1, kind: input, shape index: {}]   ;;  %s2814_s2 = inlined_call_operand.vmem [shape: f32[2,1024], index: 2, kind: input, shape index: {}]   ;;  %s2815_s3 = inlined_call_operand.vmem [shape: f32[2,1024], index: 3, kind: input, shape index: {}]   ;;  %s2816_s5 = inlined_call_operand.vmem [shape: f32[1,128], index: 5, kind: output, shape index: {}]  }
   0x1   :  { %v2096_v0 = vld [vmem:[%s2811_s4 + $0x40] sm:$0xff]   ;;  %v2119_v4 = vld [vmem:[%s2811_s4 + $0x48] sm:$0xff]   ;;  %v2143_v8 = vld [vmem:[%s2811_s4 + $0x50] sm:$0xff]   ;;  %v155_v23 = vunpack.c.l.s4 %v2058_v22  ;;  %s2062_s8 = smov 90   ;;  %vm1426_vm2 = vcmask 517120   ;;  %vm1509_vm3 = vcmask 9216  }
   0x2   :  { %v2101_v1 = vld [vmem:[%s2811_s4 + $0xc0] sm:$0xff]   ;;  %1611 = vmatprep.subr.bf16.mxu0 %v2096_v0  ;;  %v2125_v5 = vld [vmem:[%s2811_s4 + $0xc8] sm:$0xff]   ;;  %v2149_v9 = vld [vmem:[%s2811_s4 + $0xd0] sm:$0xff]   ;;  %v158_v30 = vshrl.u32 %v2817_v24, 7  ;;  %vm1407_vm4 = vcmask 1024  }
   0x3   :  { %v2107_v2 = vld [vmem:[%s2811_s4] sm:$0xff]   ;;  %1633 = vmatprep.subr.bf16.mxu1 %v2101_v1  ;;  %v2131_v6 = vld [vmem:[%s2811_s4 + $0x8] sm:$0xff]   ;;  %v2155_v10 = vld [vmem:[%s2811_s4 + $0x10] sm:$0xff]   ;;  %v156_v29 = vunpack.c.0.s8 %v155_v23 }
   0x4   :  { %v2113_v3 = vld [vmem:[%s2811_s4 + $0x80] sm:$0xff]   ;;  %1612 = vmatpush3.bf16.msra.mxu0 %v2107_v2  ;;  %v2137_v7 = vld [vmem:[%s2811_s4 + $0x88] sm:$0xff]   ;;  %v2161_v11 = vld [vmem:[%s2811_s4 + $0x90] sm:$0xff]  }
   0x5   :  { %1634 = vmatpush3.bf16.msra.mxu1 %v2113_v3  ;;  %1613 = vmatprep.subr.bf16.mxu0 %v2119_v4  ;;  %v2167_v12 = vld [vmem:[%s2811_s4 + $0x58] sm:$0xff]   ;;  %v2191_v16 = vld [vmem:[%s2811_s4 + $0x60] sm:$0xff]   ;;  %v2215_v20 = vld [vmem:[%s2811_s4 + $0x68] sm:$0xff]   ;;  %v2272_v35 = vsub.s32 %v156_v29, %v158_v30 }
   0x6   :  { %1635 = vmatprep.subr.bf16.mxu1 %v2125_v5  ;;  %v2173_v13 = vld [vmem:[%s2811_s4 + $0xd8] sm:$0xff]   ;;  %v2197_v17 = vld [vmem:[%s2811_s4 + $0xe0] sm:$0xff]   ;;  %v2221_v21 = vld [vmem:[%s2811_s4 + $0xe8] sm:$0xff]  }
   0x7   :  { %v2179_v14 = vld [vmem:[%s2811_s4 + $0x18] sm:$0xff]   ;;  %v2203_v18 = vld [vmem:[%s2811_s4 + $0x20] sm:$0xff]   ;;  %v2227_v25 = vld [vmem:[%s2811_s4 + $0x28] sm:$0xff]  }
   0x8   :  { %1614 = vmatpush3.bf16.msra.mxu0 %v2131_v6  ;;  %v2185_v15 = vld [vmem:[%s2811_s4 + $0x98] sm:$0xff]   ;;  %v2209_v19 = vld [vmem:[%s2811_s4 + $0xa0] sm:$0xff]   ;;  %v2233_v26 = vld [vmem:[%s2811_s4 + $0xa8] sm:$0xff]  }
   0x9   :  { %1636 = vmatpush3.bf16.msra.mxu1 %v2137_v7  ;;  %1615 = vmatprep.subr.bf16.mxu0 %v2143_v8  ;;  %v2239_v27 = vld [vmem:[%s2811_s4 + $0x70] sm:$0xff]   ;;  %v2264_v33 = vld [vmem:[%s2811_s4 + $0x78] sm:$0xff]   ;;  %v149_v38 = vld [vmem:[%s2812_s0] sm:$0xff] }
   0xa   :  { %1637 = vmatprep.subr.bf16.mxu1 %v2149_v9  ;;  %v2245_v28 = vld [vmem:[%s2811_s4 + $0xf0] sm:$0xff]   ;;  %v2270_v34 = vld [vmem:[%s2811_s4 + $0xf8] sm:$0xff]   ;;  %v150_v39 = vld [vmem:[%s2812_s0 + $0x8] sm:$0xff]  ;;  %v160_v40 = vrot.slane %v149_v38, %v2272_v35  ;;  %v153_v42 = vcombine.high %v149_v38, %v149_v38 }
   0xb   :  { %v2252_v31 = vld [vmem:[%s2811_s4 + $0x30] sm:$0xff]   ;;  %v2278_v36 = vld [vmem:[%s2811_s4 + $0x38] sm:$0xff]   ;;  %v170_v41 = vcombine.high %v150_v39, %v150_v39  ;;  %v2298_v43 = vld [vmem:[%s2811_s4 + $0x140] sm:$0xff]   ;;  %v2301_v44 = vrot.slane %v150_v39, %v2272_v35 }
   0xc   :  { %1616 = vmatpush3.bf16.msra.mxu0 %v2155_v10  ;;  %v2258_v32 = vld [vmem:[%s2811_s4 + $0xb0] sm:$0xff]   ;;  %v2284_v37 = vld [vmem:[%s2811_s4 + $0xb8] sm:$0xff]   ;;  %v2306_v45 = vld [vmem:[%s2811_s4 + $0x1c0] sm:$0xff]   ;;  %v168_v46 = vcombine.high %v160_v40, %v160_v40  ;;  %v167_v47 = vrot.slane %v153_v42, %v2272_v35  ;;  %v195_v49 = vpack.c.bf16 %v160_v40, %v160_v40 }
   0xd   :  { %1638 = vmatpush3.bf16.msra.mxu1 %v2161_v11  ;;  %1617 = vmatprep.subr.bf16.mxu0 %v2167_v12  ;;  %v185_v48 = vcombine.high %v2301_v44, %v2301_v44  ;;  %v2314_v50 = vrot.slane %v170_v41, %v2272_v35  ;;  %v2319_v53 = vld [vmem:[%s2811_s4 + $0x100] sm:$0xff]   ;;  %v2324_v55 = vld [vmem:[%s2811_s4 + $0x148] sm:$0xff]   ;;  %v2348_v63 = vld [vmem:[%s2811_s4 + $0x150] sm:$0xff]  }
   0xe   :  { %1639 = vmatprep.subr.bf16.mxu1 %v2173_v13  ;;  %v196_v51 = vpack.c.bf16 %v168_v46, %v168_v46  ;;  %v169_v52 = vcombine.high %v167_v47, %v167_v47  ;;  %v197_v54 = vpack.c.bf16 %v167_v47, %v167_v47  ;;  %v2331_v58 = vld [vmem:[%s2811_s4 + $0x180] sm:$0xff]   ;;  %v2336_v60 = vld [vmem:[%s2811_s4 + $0x1c8] sm:$0xff]   ;;  %v2360_v23 = vld [vmem:[%s2811_s4 + $0x1d0] sm:$0xff]  }
   0xf   :  { %v186_v56 = vcombine.high %v2314_v50, %v2314_v50  ;;  %v200_v59 = vpack.c.bf16 %v185_v48, %v185_v48  ;;  %v2342_v62 = vld [vmem:[%s2811_s4 + $0x108] sm:$0xff]   ;;  %v2366_v29 = vld [vmem:[%s2811_s4 + $0x110] sm:$0xff]   ;;  %v2372_v30 = vld [vmem:[%s2811_s4 + $0x158] sm:$0xff]  }
  0x10   :  { %1618 = vmatpush3.bf16.msra.mxu0 %v2179_v14  ;;  %619 = vmatprep.mubr.bf16.mxu0 %v196_v51  ;;  %v198_v57 = vpack.c.bf16 %v169_v52, %v169_v52  ;;  %v2354_v22 = vld [vmem:[%s2811_s4 + $0x188] sm:$0xff]   ;;  %v2378_v38 = vld [vmem:[%s2811_s4 + $0x190] sm:$0xff]   ;;  %v2384_v39 = vld [vmem:[%s2811_s4 + $0x1d8] sm:$0xff]  }
  0x11   :  { %1640 = vmatpush3.bf16.msra.mxu1 %v2185_v15  ;;  %1619 = vmatprep.subr.bf16.mxu0 %v2191_v16  ;;  %v202_v61 = vpack.c.bf16 %v186_v56, %v186_v56  ;;  %2848 = vst [vmem:[#allocation2_spill] sm:$0xff] %v2384_v39  ;;  %v2390_v40 = vld [vmem:[%s2811_s4 + $0x118] sm:$0xff]   ;;  %v2396_v41 = vld [vmem:[%s2811_s4 + $0x160] sm:$0xff]   ;;  %v2420_v48 = vld [vmem:[%s2811_s4 + $0x168] sm:$0xff]  }
  0x12   :  { %1641 = vmatprep.subr.bf16.mxu1 %v2197_v17  ;;  %659 = vmatprep.mubr.bf16.mxu1 %v198_v57  ;;  %2849 = vst [vmem:[#allocation3_spill] sm:$0xff] %v2390_v40  ;;  %2850 = vst [vmem:[#allocation4_spill] sm:$0xff] %v2396_v41  ;;  %v2402_v42 = vld [vmem:[%s2811_s4 + $0x198] sm:$0xff]   ;;  %v2408_v46 = vld [vmem:[%s2811_s4 + $0x1e0] sm:$0xff]  }
  0x13   :  { %2851 = vst [vmem:[#allocation5_spill] sm:$0xff] %v2402_v42  ;;  %2852 = vst [vmem:[#allocation6_spill] sm:$0xff] %v2408_v46  ;;  %v2414_v47 = vld [vmem:[%s2811_s4 + $0x120] sm:$0xff]   ;;  %v2432_v51 = vld [vmem:[%s2811_s4 + $0x1e8] sm:$0xff]  }
  0x14   :  { %1620 = vmatpush3.bf16.msra.mxu0 %v2203_v18  ;;  %2853 = vst [vmem:[#allocation7_spill] sm:$0xff] %v2414_v47  ;;  %2854 = vst [vmem:[#allocation8_spill] sm:$0xff] %v2420_v48  ;;  %v2438_v52 = vld [vmem:[%s2811_s4 + $0x128] sm:$0xff]   ;;  %v2456_v57 = vld [vmem:[%s2811_s4 + $0x1f0] sm:$0xff]  }
  0x15   :  { %1642 = vmatpush3.bf16.msra.mxu1 %v2209_v19  ;;  %1621 = vmatprep.subr.bf16.mxu0 %v2215_v20  ;;  %2856 = vst [vmem:[#allocation10_spill] sm:$0xff] %v2432_v51  ;;  %2857 = vst [vmem:[#allocation11_spill] sm:$0xff] %v2438_v52  ;;  %v2450_v56 = vld [vmem:[%s2811_s4 + $0x1a8] sm:$0xff]   ;;  %v2474_v24 = vld [vmem:[%s2811_s4 + $0x1b0] sm:$0xff]  }
  0x16   :  { %1643 = vmatprep.subr.bf16.mxu1 %v2221_v21  ;;  %2859 = vst [vmem:[#allocation13_spill] sm:$0xff] %v2450_v56  ;;  %2860 = vst [vmem:[#allocation14_spill] sm:$0xff] %v2456_v57 }
  0x17   :  { %2863 = vst [vmem:[#allocation17_spill] sm:$0xff] %v2474_v24 }
  0x18   :  { %1622 = vmatpush3.bf16.msra.mxu0 %v2227_v25 }
  0x19   :  { %1644 = vmatpush3.bf16.msra.mxu1 %v2233_v26  ;;  %1623 = vmatprep.subr.bf16.mxu0 %v2239_v27 }
  0x1a   :  { %1645 = vmatprep.subr.bf16.mxu1 %v2245_v28 }
  0x1c   :  { %1624 = vmatpush3.bf16.msra.mxu0 %v2252_v31 }
  0x1d   :  { %1646 = vmatpush3.bf16.msra.mxu1 %v2258_v32  ;;  %1625 = vmatprep.subr.bf16.mxu0 %v2264_v33 }
  0x1e   :  { %1647 = vmatprep.subr.bf16.mxu1 %v2270_v34 }
  0x20   :  { %1626 = vmatpush3.bf16.msra.mxu0 %v2278_v36 }
  0x21   :  { %1648 = vmatpush3.bf16.msra.mxu1 %v2284_v37  ;;  %1655 = vmatprep.subr.bf16.mxu0 %v2298_v43 }
  0x22   :  { %1677 = vmatprep.subr.bf16.mxu1 %v2306_v45 }
  0x23   :  { %620 = vmatmul.mubr.bf16.vlgmr.msra.gmra.mrb[0].mxu0 %v195_v49  ;;  %v2426_v49 = vld [vmem:[%s2811_s4 + $0x1a0] sm:$0xff]  }
  0x24   :  { %1656 = vmatpush3.bf16.msra.mxu0 %v2319_v53  ;;  %660 = vmatmul.mubr.bf16.vlgmr.msra.gmra.mrb[0].mxu1 %v197_v54  ;;  %2855 = vst [vmem:[#allocation9_spill] sm:$0xff] %v2426_v49  ;;  %v2444_v54 = vld [vmem:[%s2811_s4 + $0x170] sm:$0xff]  }
  0x25   :  { %1657 = vmatprep.subr.bf16.mxu0 %v2324_v55  ;;  %1678 = vmatpush3.bf16.msra.mxu1 %v2331_v58  ;;  %2858 = vst [vmem:[#allocation12_spill] sm:$0xff] %v2444_v54 }
  0x26   :  { %699 = vmatprep.mubr.bf16.mxu0 %v200_v59  ;;  %1679 = vmatprep.subr.bf16.mxu1 %v2336_v60  ;;  %v2462_v59 = vld [vmem:[%s2811_s4 + $0x130] sm:$0xff]  }
  0x27   :  { %739 = vmatprep.mubr.bf16.mxu1 %v202_v61  ;;  %2861 = vst [vmem:[#allocation15_spill] sm:$0xff] %v2462_v59  ;;  %v2468_v61 = vld [vmem:[%s2811_s4 + $0x178] sm:$0xff]  }
  0x28   :  { %1658 = vmatpush3.bf16.msra.mxu0 %v2342_v62  ;;  %2862 = vst [vmem:[#allocation16_spill] sm:$0xff] %v2468_v61 }
  0x29   :  { %1659 = vmatprep.subr.bf16.mxu0 %v2348_v63  ;;  %1680 = vmatpush3.bf16.msra.mxu1 %v2354_v22 }
  0x2a   :  { %1681 = vmatprep.subr.bf16.mxu1 %v2360_v23 }
  0x2c   :  { %1660 = vmatpush3.bf16.msra.mxu0 %v2366_v29 }
  0x2d   :  { %1661 = vmatprep.subr.bf16.mxu0 %v2372_v30  ;;  %1682 = vmatpush3.bf16.msra.mxu1 %v2378_v38 }
  0x2e   :  { %1683 = vmatprep.subr.bf16.mxu1 %v2384_v39 }
  0x30   :  { %1662 = vmatpush3.bf16.msra.mxu0 %v2390_v40 }
  0x31   :  { %1663 = vmatprep.subr.bf16.mxu0 %v2396_v41  ;;  %1684 = vmatpush3.bf16.msra.mxu1 %v2402_v42 }
  0x32   :  { %1685 = vmatprep.subr.bf16.mxu1 %v2408_v46 }
  0x34   :  { %1664 = vmatpush3.bf16.msra.mxu0 %v2414_v47  ;;  %v199_v47 = vpack.c.bf16 %v2301_v44, %v2301_v44 }
  0x35   :  { %1665 = vmatprep.subr.bf16.mxu0 %v2420_v48  ;;  %1686 = vmatpush3.bf16.msra.mxu1 %v2426_v49 }
  0x36   :  { %1687 = vmatprep.subr.bf16.mxu1 %v2432_v51 }
  0x38   :  { %1666 = vmatpush3.bf16.msra.mxu0 %v2438_v52  ;;  %v2480_v52 = vld [vmem:[%s2811_s4 + $0x1f8] sm:$0xff]  }
  0x39   :  { %1667 = vmatprep.subr.bf16.mxu0 %v2444_v54  ;;  %1688 = vmatpush3.bf16.msra.mxu1 %v2450_v56  ;;  %v747_v54 = vld [vmem:[%s2813_s1] sm:$0xff]  ;;  %v2489_v56 = vld [vmem:[%s2811_s4 + $0x138] sm:$0xff]  }
  0x3a   :  { %1689 = vmatprep.subr.bf16.mxu1 %v2456_v57  ;;  %v758_v51 = vrot.slane %v747_v54, %v2272_v35  ;;  %v751_v49 = vcombine.high %v747_v54, %v747_v54  ;;  %v2497_v57 = vld [vmem:[%s2811_s4 + $0x1b8] sm:$0xff]  }
  0x3c   :  { %1668 = vmatpush3.bf16.msra.mxu0 %v2462_v59  ;;  %v766_v48 = vcombine.high %v758_v51, %v758_v51  ;;  %v765_v59 = vrot.slane %v751_v49, %v2272_v35  ;;  %v793_v49 = vpack.c.bf16 %v758_v51, %v758_v51  ;;  %v2864_v51 = vld [vmem:[#allocation6_spill] sm:$0xff] }
  0x3d   :  { %1669 = vmatprep.subr.bf16.mxu0 %v2468_v61  ;;  %1690 = vmatpush3.bf16.msra.mxu1 %v2474_v24  ;;  %v201_v24 = vpack.c.bf16 %v2314_v50, %v2314_v50 }
  0x3e   :  { %1691 = vmatprep.subr.bf16.mxu1 %v2480_v52  ;;  %v794_v54 = vpack.c.bf16 %v766_v48, %v766_v48  ;;  %v767_v46 = vcombine.high %v765_v59, %v765_v59 }
  0x40   :  { %1670 = vmatpush3.bf16.msra.mxu0 %v2489_v56  ;;  %v796_v61 = vpack.c.bf16 %v767_v46, %v767_v46 }
  0x41   :  { %1699 = vmatprep.subr.bf16.mxu0 %v2096_v0  ;;  %1692 = vmatpush3.bf16.msra.mxu1 %v2497_v57 }
  0x42   :  { %1721 = vmatprep.subr.bf16.mxu1 %v2101_v1 }
  0x43   :  { %700 = vmatmul.mubr.bf16.vlgmr.msra.gmra.mrb[4].mxu0 %v199_v47 }
  0x44   :  { %1700 = vmatpush3.bf16.msra.mxu0 %v2107_v2  ;;  %833 = vmatprep.mubr.bf16.mxu0 %v794_v54  ;;  %v795_v54 = vpack.c.bf16 %v765_v59, %v765_v59  ;;  %v961_v59 = vld [vmem:[%s2814_s2] sm:$0xff] }
  0x45   :  { %740 = vmatmul.mubr.bf16.vlgmr.msra.gmra.mrb[4].mxu1 %v201_v24  ;;  %1701 = vmatprep.subr.bf16.mxu0 %v2119_v4  ;;  %v748_v24 = vld [vmem:[%s2813_s1 + $0x8] sm:$0xff] }
  0x46   :  { %1722 = vmatpush3.bf16.msra.mxu1 %v2113_v3  ;;  %873 = vmatprep.mubr.bf16.mxu1 %v796_v61  ;;  %v768_v44 = vcombine.high %v748_v24, %v748_v24  ;;  %v2534_v50 = vrot.slane %v748_v24, %v2272_v35 }
  0x47   :  { %1723 = vmatprep.subr.bf16.mxu1 %v2125_v5 }
  0x48   :  { %1702 = vmatpush3.bf16.msra.mxu0 %v2131_v6  ;;  %v2539_v46 = vrot.slane %v768_v44, %v2272_v35  ;;  %v783_v47 = vcombine.high %v2534_v50, %v2534_v50  ;;  %v2865_v44 = vld [vmem:[#allocation7_spill] sm:$0xff] }
  0x49   :  { %1703 = vmatprep.subr.bf16.mxu0 %v2143_v8 }
  0x4a   :  { %1724 = vmatpush3.bf16.msra.mxu1 %v2137_v7  ;;  %v784_v48 = vcombine.high %v2539_v46, %v2539_v46  ;;  %v798_v61 = vpack.c.bf16 %v783_v47, %v783_v47  ;;  %v2866_v47 = vld [vmem:[#allocation8_spill] sm:$0xff] }
  0x4b   :  { %1725 = vmatprep.subr.bf16.mxu1 %v2149_v9 }
  0x4c   :  { %1704 = vmatpush3.bf16.msra.mxu0 %v2155_v10  ;;  %v800_v24 = vpack.c.bf16 %v784_v48, %v784_v48  ;;  %v2867_v48 = vld [vmem:[#allocation9_spill] sm:$0xff] }
  0x4d   :  { %1705 = vmatprep.subr.bf16.mxu0 %v2167_v12 }
  0x4e   :  { %1726 = vmatpush3.bf16.msra.mxu1 %v2161_v11 }
  0x4f   :  { %1727 = vmatprep.subr.bf16.mxu1 %v2173_v13 }
  0x50   :  { %1706 = vmatpush3.bf16.msra.mxu0 %v2179_v14 }
  0x51   :  { %1707 = vmatprep.subr.bf16.mxu0 %v2191_v16 }
  0x52   :  { %1728 = vmatpush3.bf16.msra.mxu1 %v2185_v15 }
  0x53   :  { %1729 = vmatprep.subr.bf16.mxu1 %v2197_v17 }
  0x54   :  { %1708 = vmatpush3.bf16.msra.mxu0 %v2203_v18 }
  0x55   :  { %1709 = vmatprep.subr.bf16.mxu0 %v2215_v20 }
  0x56   :  { %1730 = vmatpush3.bf16.msra.mxu1 %v2209_v19 }
  0x57   :  { %1731 = vmatprep.subr.bf16.mxu1 %v2221_v21 }
  0x58   :  { %1710 = vmatpush3.bf16.msra.mxu0 %v2227_v25 }
  0x59   :  { %1711 = vmatprep.subr.bf16.mxu0 %v2239_v27 }
  0x5a   :  { %1732 = vmatpush3.bf16.msra.mxu1 %v2233_v26 }
  0x5b   :  { %1733 = vmatprep.subr.bf16.mxu1 %v2245_v28 }
  0x5c   :  { %1712 = vmatpush3.bf16.msra.mxu0 %v2252_v31 }
  0x5d   :  { %1713 = vmatprep.subr.bf16.mxu0 %v2264_v33 }
  0x5e   :  { %1734 = vmatpush3.bf16.msra.mxu1 %v2258_v32 }
  0x5f   :  { %1735 = vmatprep.subr.bf16.mxu1 %v2270_v34 }
  0x60   :  { %1714 = vmatpush3.bf16.msra.mxu0 %v2278_v36 }
  0x61   :  { %1743 = vmatprep.subr.bf16.mxu0 %v2298_v43 }
  0x62   :  { %1736 = vmatpush3.bf16.msra.mxu1 %v2284_v37 }
  0x63   :  { %834 = vmatmul.mubr.bf16.vlgmr.msra.gmra.mrb[8].mxu0 %v793_v49  ;;  %1765 = vmatprep.subr.bf16.mxu1 %v2306_v45  ;;  %v965_v49 = vcombine.high %v961_v59, %v961_v59 }
  0x64   :  { %1744 = vmatpush3.bf16.msra.mxu0 %v2319_v53  ;;  %913 = vmatprep.mubr.bf16.mxu0 %v798_v61  ;;  %v2868_v61 = vld [vmem:[#allocation10_spill] sm:$0xff] }
  0x65   :  { %874 = vmatmul.mubr.bf16.vlgmr.msra.gmra.mrb[8].mxu1 %v795_v54  ;;  %1745 = vmatprep.subr.bf16.mxu0 %v2324_v55  ;;  %v2869_v54 = vld [vmem:[#allocation11_spill] sm:$0xff] }
  0x66   :  { %1766 = vmatpush3.bf16.msra.mxu1 %v2331_v58  ;;  %953 = vmatprep.mubr.bf16.mxu1 %v800_v24  ;;  %v2579_v24 = vrot.slane %v961_v59, %v2272_v35 }
  0x67   :  { %1767 = vmatprep.subr.bf16.mxu1 %v2336_v60 }
  0x68   :  { %1746 = vmatpush3.bf16.msra.mxu0 %v2342_v62 }
  0x69   :  { %1747 = vmatprep.subr.bf16.mxu0 %v2348_v63 }
  0x6a   :  { %1768 = vmatpush3.bf16.msra.mxu1 %v2354_v22 }
  0x6b   :  { %1769 = vmatprep.subr.bf16.mxu1 %v2360_v23 }
  0x6c   :  { %1748 = vmatpush3.bf16.msra.mxu0 %v2366_v29 }
  0x6d   :  { %1749 = vmatprep.subr.bf16.mxu0 %v2372_v30 }
  0x6e   :  { %1770 = vmatpush3.bf16.msra.mxu1 %v2378_v38 }
  0x6f   :  { %1771 = vmatprep.subr.bf16.mxu1 %v2384_v39 }
  0x70   :  { %1750 = vmatpush3.bf16.msra.mxu0 %v2390_v40 }
  0x71   :  { %1751 = vmatprep.subr.bf16.mxu0 %v2396_v41  ;;  %v2584_v41 = vrot.slane %v965_v49, %v2272_v35  ;;  %v797_v49 = vpack.c.bf16 %v2534_v50, %v2534_v50  ;;  %v962_v50 = vld [vmem:[%s2814_s2 + $0x8] sm:$0xff] }
  0x72   :  { %1772 = vmatpush3.bf16.msra.mxu1 %v2402_v42  ;;  %v2870_v42 = vld [vmem:[#allocation12_spill] sm:$0xff] }
  0x73   :  { %1773 = vmatprep.subr.bf16.mxu1 %v2864_v51  ;;  %v2871_v51 = vld [vmem:[#allocation13_spill] sm:$0xff]  ;;  %v981_v59 = vcombine.high %v2584_v41, %v2584_v41 }
  0x74   :  { %1752 = vmatpush3.bf16.msra.mxu0 %v2865_v44  ;;  %v2872_v44 = vld [vmem:[#allocation14_spill] sm:$0xff] }
  0x75   :  { %1753 = vmatprep.subr.bf16.mxu0 %v2866_v47  ;;  %v2873_v47 = vld [vmem:[#allocation15_spill] sm:$0xff] }
  0x76   :  { %1774 = vmatpush3.bf16.msra.mxu1 %v2867_v48  ;;  %v980_v48 = vcombine.high %v2579_v24, %v2579_v24 }
  0x77   :  { %1775 = vmatprep.subr.bf16.mxu1 %v2868_v61  ;;  %v2874_v61 = vld [vmem:[#allocation16_spill] sm:$0xff] }
  0x78   :  { %1754 = vmatpush3.bf16.msra.mxu0 %v2869_v54  ;;  %v2875_v54 = vld [vmem:[#allocation17_spill] sm:$0xff] }
  0x79   :  { %1755 = vmatprep.subr.bf16.mxu0 %v2870_v42 }
  0x7a   :  { %1776 = vmatpush3.bf16.msra.mxu1 %v2871_v51 }
  0x7b   :  { %1777 = vmatprep.subr.bf16.mxu1 %v2872_v44  ;;  %v1008_v44 = vpack.c.bf16 %v980_v48, %v980_v48 }
  0x7c   :  { %1756 = vmatpush3.bf16.msra.mxu0 %v2873_v47  ;;  %v799_v47 = vpack.c.bf16 %v2539_v46, %v2539_v46  ;;  %v982_v46 = vcombine.high %v962_v50, %v962_v50 }
  0x7d   :  { %1757 = vmatprep.subr.bf16.mxu0 %v2874_v61  ;;  %v1010_v61 = vpack.c.bf16 %v981_v59, %v981_v59  ;;  %v1007_v59 = vpack.c.bf16 %v2579_v24, %v2579_v24  ;;  %v2877_v24 = vld [vmem:[#allocation5_spill] sm:$0xff] }
  0x7e   :  { %1778 = vmatpush3.bf16.msra.mxu1 %v2875_v54 }
  0x7f   :  { %1779 = vmatprep.subr.bf16.mxu1 %v2480_v52 }
  0x80   :  { %1758 = vmatpush3.bf16.msra.mxu0 %v2489_v56 }
  0x81   :  { %1787 = vmatprep.subr.bf16.mxu0 %v2096_v0 }
  0x82   :  { %1780 = vmatpush3.bf16.msra.mxu1 %v2497_v57 }
  0x83   :  { %914 = vmatmul.mubr.bf16.vlgmr.msra.gmra.mrb[12].mxu0 %v797_v49  ;;  %1809 = vmatprep.subr.bf16.mxu1 %v2101_v1 }
  0x84   :  { %1788 = vmatpush3.bf16.msra.mxu0 %v2107_v2  ;;  %1047 = vmatprep.mubr.bf16.mxu0 %v1008_v44  ;;  %v2628_v44 = vrot.slane %v962_v50, %v2272_v35  ;;  %v1009_v50 = vpack.c.bf16 %v2584_v41, %v2584_v41  ;;  %v2876_v41 = vld [vmem:[#allocation4_spill] sm:$0xff] }
  0x85   :  { %954 = vmatmul.mubr.bf16.vlgmr.msra.gmra.mrb[12].mxu1 %v799_v47  ;;  %1789 = vmatprep.subr.bf16.mxu0 %v2119_v4  ;;  %v2633_v47 = vrot.slane %v982_v46, %v2272_v35 }
  0x86   :  { %1810 = vmatpush3.bf16.msra.mxu1 %v2113_v3  ;;  %1087 = vmatprep.mubr.bf16.mxu1 %v1010_v61  ;;  %v997_v48 = vcombine.high %v2628_v44, %v2628_v44 }
  0x87   :  { %1811 = vmatprep.subr.bf16.mxu1 %v2125_v5  ;;  %v998_v61 = vcombine.high %v2633_v47, %v2633_v47 }
  0x88   :  { %1790 = vmatpush3.bf16.msra.mxu0 %v2131_v6  ;;  %v1012_v49 = vpack.c.bf16 %v997_v48, %v997_v48  ;;  %v2878_v48 = vld [vmem:[#allocation6_spill] sm:$0xff] }
  0x89   :  { %1791 = vmatprep.subr.bf16.mxu0 %v2143_v8  ;;  %v1014_v46 = vpack.c.bf16 %v998_v61, %v998_v61  ;;  %v1175_v61 = vld [vmem:[%s2815_s3] sm:$0xff] }
  0x8a   :  { %1812 = vmatpush3.bf16.msra.mxu1 %v2137_v7 }
  0x8b   :  { %1813 = vmatprep.subr.bf16.mxu1 %v2149_v9 }
  0x8c   :  { %1792 = vmatpush3.bf16.msra.mxu0 %v2155_v10 }
  0x8d   :  { %1793 = vmatprep.subr.bf16.mxu0 %v2167_v12 }
  0x8e   :  { %1814 = vmatpush3.bf16.msra.mxu1 %v2161_v11 }
  0x8f   :  { %1815 = vmatprep.subr.bf16.mxu1 %v2173_v13 }
  0x90   :  { %1794 = vmatpush3.bf16.msra.mxu0 %v2179_v14 }
  0x91   :  { %1795 = vmatprep.subr.bf16.mxu0 %v2191_v16 }
  0x92   :  { %1816 = vmatpush3.bf16.msra.mxu1 %v2185_v15 }
  0x93   :  { %1817 = vmatprep.subr.bf16.mxu1 %v2197_v17 }
  0x94   :  { %1796 = vmatpush3.bf16.msra.mxu0 %v2203_v18 }
  0x95   :  { %1797 = vmatprep.subr.bf16.mxu0 %v2215_v20 }
  0x96   :  { %1818 = vmatpush3.bf16.msra.mxu1 %v2209_v19 }
  0x97   :  { %1819 = vmatprep.subr.bf16.mxu1 %v2221_v21 }
  0x98   :  { %1798 = vmatpush3.bf16.msra.mxu0 %v2227_v25 }
  0x99   :  { %1799 = vmatprep.subr.bf16.mxu0 %v2239_v27 }
  0x9a   :  { %1820 = vmatpush3.bf16.msra.mxu1 %v2233_v26 }
  0x9b   :  { %1821 = vmatprep.subr.bf16.mxu1 %v2245_v28 }
  0x9c   :  { %1800 = vmatpush3.bf16.msra.mxu0 %v2252_v31 }
  0x9d   :  { %1801 = vmatprep.subr.bf16.mxu0 %v2264_v33 }
  0x9e   :  { %1822 = vmatpush3.bf16.msra.mxu1 %v2258_v32 }
  0x9f   :  { %1823 = vmatprep.subr.bf16.mxu1 %v2270_v34 }
  0xa0   :  { %1802 = vmatpush3.bf16.msra.mxu0 %v2278_v36 }
  0xa1   :  { %1831 = vmatprep.subr.bf16.mxu0 %v2298_v43 }
  0xa2   :  { %1824 = vmatpush3.bf16.msra.mxu1 %v2284_v37 }
  0xa3   :  { %1048 = vmatmul.mubr.bf16.vlgmr.msra.gmra.mrb[16].mxu0 %v1007_v59  ;;  %1853 = vmatprep.subr.bf16.mxu1 %v2306_v45  ;;  %v2879_v59 = vld [vmem:[#allocation7_spill] sm:$0xff] }
  0xa4   :  { %1832 = vmatpush3.bf16.msra.mxu0 %v2319_v53  ;;  %1127 = vmatprep.mubr.bf16.mxu0 %v1012_v49  ;;  %v2880_v49 = vld [vmem:[#allocation8_spill] sm:$0xff] }
  0xa5   :  { %1088 = vmatmul.mubr.bf16.vlgmr.msra.gmra.mrb[16].mxu1 %v1009_v50  ;;  %1833 = vmatprep.subr.bf16.mxu0 %v2324_v55  ;;  %v2881_v50 = vld [vmem:[#allocation9_spill] sm:$0xff] }
  0xa6   :  { %1854 = vmatpush3.bf16.msra.mxu1 %v2331_v58  ;;  %1167 = vmatprep.mubr.bf16.mxu1 %v1014_v46  ;;  %v1179_v46 = vcombine.high %v1175_v61, %v1175_v61 }
  0xa7   :  { %1855 = vmatprep.subr.bf16.mxu1 %v2336_v60 }
  0xa8   :  { %1834 = vmatpush3.bf16.msra.mxu0 %v2342_v62 }
  0xa9   :  { %1835 = vmatprep.subr.bf16.mxu0 %v2348_v63 }
  0xaa   :  { %1856 = vmatpush3.bf16.msra.mxu1 %v2354_v22 }
  0xab   :  { %1857 = vmatprep.subr.bf16.mxu1 %v2360_v23 }
  0xac   :  { %1836 = vmatpush3.bf16.msra.mxu0 %v2366_v29 }
  0xad   :  { %1837 = vmatprep.subr.bf16.mxu0 %v2372_v30 }
  0xae   :  { %1858 = vmatpush3.bf16.msra.mxu1 %v2378_v38 }
  0xaf   :  { %1859 = vmatprep.subr.bf16.mxu1 %v2384_v39  ;;  %v2882_v39 = vld [vmem:[#allocation10_spill] sm:$0xff] }
  0xb0   :  { %1838 = vmatpush3.bf16.msra.mxu0 %v2390_v40  ;;  %v2883_v40 = vld [vmem:[#allocation11_spill] sm:$0xff] }
  0xb1   :  { %1839 = vmatprep.subr.bf16.mxu0 %v2876_v41  ;;  %v2677_v41 = vrot.slane %v1175_v61, %v2272_v35 }
  0xb2   :  { %1860 = vmatpush3.bf16.msra.mxu1 %v2877_v24 }
  0xb3   :  { %1861 = vmatprep.subr.bf16.mxu1 %v2878_v48  ;;  %v2682_v48 = vrot.slane %v1179_v46, %v2272_v35  ;;  %v1011_v46 = vpack.c.bf16 %v2628_v44, %v2628_v44 }
  0xb4   :  { %1840 = vmatpush3.bf16.msra.mxu0 %v2879_v59  ;;  %v2884_v59 = vld [vmem:[#allocation14_spill] sm:$0xff] }
  0xb5   :  { %1841 = vmatprep.subr.bf16.mxu0 %v2880_v49  ;;  %v2885_v49 = vld [vmem:[#allocation15_spill] sm:$0xff]  ;;  %v1195_v61 = vcombine.high %v2682_v48, %v2682_v48 }
  0xb6   :  { %1862 = vmatpush3.bf16.msra.mxu1 %v2881_v50  ;;  %v1194_v50 = vcombine.high %v2677_v41, %v2677_v41 }
  0xb7   :  { %1863 = vmatprep.subr.bf16.mxu1 %v2882_v39  ;;  %v2886_v39 = vld [vmem:[#allocation16_spill] sm:$0xff] }
  0xb8   :  { %1842 = vmatpush3.bf16.msra.mxu0 %v2883_v40 }
  0xb9   :  { %1843 = vmatprep.subr.bf16.mxu0 %v2870_v42 }
  0xba   :  { %1864 = vmatpush3.bf16.msra.mxu1 %v2871_v51 }
  0xbb   :  { %1865 = vmatprep.subr.bf16.mxu1 %v2884_v59  ;;  %v1222_v59 = vpack.c.bf16 %v1194_v50, %v1194_v50 }
  0xbc   :  { %1844 = vmatpush3.bf16.msra.mxu0 %v2885_v49  ;;  %v1013_v49 = vpack.c.bf16 %v2633_v47, %v2633_v47 }
  0xbd   :  { %1845 = vmatprep.subr.bf16.mxu0 %v2886_v39  ;;  %v1224_v39 = vpack.c.bf16 %v1195_v61, %v1195_v61 }
  0xbe   :  { %1866 = vmatpush3.bf16.msra.mxu1 %v2875_v54 }
  0xbf   :  { %1867 = vmatprep.subr.bf16.mxu1 %v2480_v52 }
  0xc0   :  { %1846 = vmatpush3.bf16.msra.mxu0 %v2489_v56 }
  0xc1   :  { %1875 = vmatprep.subr.bf16.mxu0 %v2096_v0  ;;  %v1176_v0 = vld [vmem:[%s2815_s3 + $0x8] sm:$0xff]  ;;  %s2059_s3 = smov 96  }
  0xc2   :  { %1868 = vmatpush3.bf16.msra.mxu1 %v2497_v57 }
  0xc3   :  { %1128 = vmatmul.mubr.bf16.vlgmr.msra.gmra.mrb[20].mxu0 %v1011_v46  ;;  %1897 = vmatprep.subr.bf16.mxu1 %v2101_v1  ;;  %v1196_v1 = vcombine.high %v1176_v0, %v1176_v0 }
  0xc4   :  { %1876 = vmatpush3.bf16.msra.mxu0 %v2107_v2  ;;  %1261 = vmatprep.mubr.bf16.mxu0 %v1222_v59  ;;  %v2726_v2 = vrot.slane %v1176_v0, %v2272_v35 }
  0xc5   :  { %1168 = vmatmul.mubr.bf16.vlgmr.msra.gmra.mrb[20].mxu1 %v1013_v49  ;;  %1877 = vmatprep.subr.bf16.mxu0 %v2119_v4 }
  0xc6   :  { %1898 = vmatpush3.bf16.msra.mxu1 %v2113_v3  ;;  %1301 = vmatprep.mubr.bf16.mxu1 %v1224_v39  ;;  %v2731_v3 = vrot.slane %v1196_v1, %v2272_v35  ;;  %v1211_v4 = vcombine.high %v2726_v2, %v2726_v2  ;;  %v2896_v35 = vld [vmem:[#allocation15_spill] sm:$0xff] }
  0xc7   :  { %1899 = vmatprep.subr.bf16.mxu1 %v2125_v5 }
  0xc8   :  { %1878 = vmatpush3.bf16.msra.mxu0 %v2131_v6  ;;  %v1212_v5 = vcombine.high %v2731_v3, %v2731_v3  ;;  %v1221_v6 = vpack.c.bf16 %v2677_v41, %v2677_v41 }
  0xc9   :  { %1879 = vmatprep.subr.bf16.mxu0 %v2143_v8  ;;  %v1223_v8 = vpack.c.bf16 %v2682_v48, %v2682_v48 }
  0xca   :  { %1900 = vmatpush3.bf16.msra.mxu1 %v2137_v7  ;;  %v1226_v7 = vpack.c.bf16 %v1211_v4, %v1211_v4 }
  0xcb   :  { %1901 = vmatprep.subr.bf16.mxu1 %v2149_v9  ;;  %v1228_v9 = vpack.c.bf16 %v1212_v5, %v1212_v5 }
  0xcc   :  { %1880 = vmatpush3.bf16.msra.mxu0 %v2155_v10  ;;  %v2887_v10 = vld [vmem:[#allocation2_spill] sm:$0xff] }
  0xcd   :  { %1881 = vmatprep.subr.bf16.mxu0 %v2167_v12  ;;  %v2889_v12 = vld [vmem:[#allocation4_spill] sm:$0xff] }
  0xce   :  { %1902 = vmatpush3.bf16.msra.mxu1 %v2161_v11  ;;  %v2888_v11 = vld [vmem:[#allocation3_spill] sm:$0xff] }
  0xcf   :  { %1903 = vmatprep.subr.bf16.mxu1 %v2173_v13  ;;  %v2890_v13 = vld [vmem:[#allocation6_spill] sm:$0xff] }
  0xd0   :  { %1882 = vmatpush3.bf16.msra.mxu0 %v2179_v14  ;;  %v2891_v14 = vld [vmem:[#allocation7_spill] sm:$0xff] }
  0xd1   :  { %1883 = vmatprep.subr.bf16.mxu0 %v2191_v16  ;;  %v2893_v16 = vld [vmem:[#allocation9_spill] sm:$0xff] }
  0xd2   :  { %1904 = vmatpush3.bf16.msra.mxu1 %v2185_v15  ;;  %v2892_v15 = vld [vmem:[#allocation8_spill] sm:$0xff] }
  0xd3   :  { %1905 = vmatprep.subr.bf16.mxu1 %v2197_v17 }
  0xd4   :  { %1884 = vmatpush3.bf16.msra.mxu0 %v2203_v18 }
  0xd5   :  { %1885 = vmatprep.subr.bf16.mxu0 %v2215_v20 }
  0xd6   :  { %1906 = vmatpush3.bf16.msra.mxu1 %v2209_v19  ;;  %v2894_v19 = vld [vmem:[#allocation10_spill] sm:$0xff] }
  0xd7   :  { %1907 = vmatprep.subr.bf16.mxu1 %v2221_v21 }
  0xd8   :  { %1886 = vmatpush3.bf16.msra.mxu0 %v2227_v25 }
  0xd9   :  { %1887 = vmatprep.subr.bf16.mxu0 %v2239_v27 }
  0xda   :  { %1908 = vmatpush3.bf16.msra.mxu1 %v2233_v26 }
  0xdb   :  { %1909 = vmatprep.subr.bf16.mxu1 %v2245_v28 }
  0xdc   :  { %1888 = vmatpush3.bf16.msra.mxu0 %v2252_v31 }
  0xdd   :  { %1889 = vmatprep.subr.bf16.mxu0 %v2264_v33  ;;  %v2895_v33 = vld [vmem:[#allocation14_spill] sm:$0xff] }
  0xde   :  { %1910 = vmatpush3.bf16.msra.mxu1 %v2258_v32 }
  0xdf   :  { %1911 = vmatprep.subr.bf16.mxu1 %v2270_v34 }
  0xe0   :  { %1890 = vmatpush3.bf16.msra.mxu0 %v2278_v36  ;;  %v2897_v36 = vld [vmem:[#allocation16_spill] sm:$0xff] }
  0xe1   :  { %1919 = vmatprep.subr.bf16.mxu0 %v2298_v43  ;;  %v1227_v43 = vpack.c.bf16 %v2731_v3, %v2731_v3 }
  0xe2   :  { %1912 = vmatpush3.bf16.msra.mxu1 %v2284_v37  ;;  %v1225_v37 = vpack.c.bf16 %v2726_v2, %v2726_v2 }
  0xe3   :  { %1262 = vmatmul.mubr.bf16.vlgmr.msra.gmra.mrb[24].mxu0 %v1221_v6  ;;  %1941 = vmatprep.subr.bf16.mxu1 %v2306_v45 }
  0xe4   :  { %1920 = vmatpush3.bf16.msra.mxu0 %v2319_v53  ;;  %1341 = vmatprep.mubr.bf16.mxu0 %v1226_v7 }
  0xe5   :  { %1302 = vmatmul.mubr.bf16.vlgmr.msra.gmra.mrb[24].mxu1 %v1223_v8  ;;  %1921 = vmatprep.subr.bf16.mxu0 %v2324_v55 }
  0xe6   :  { %1942 = vmatpush3.bf16.msra.mxu1 %v2331_v58  ;;  %1381 = vmatprep.mubr.bf16.mxu1 %v1228_v9 }
  0xe7   :  { %1943 = vmatprep.subr.bf16.mxu1 %v2336_v60 }
  0xe8   :  { %1922 = vmatpush3.bf16.msra.mxu0 %v2342_v62 }
  0xe9   :  { %1923 = vmatprep.subr.bf16.mxu0 %v2348_v63 }
  0xea   :  { %1944 = vmatpush3.bf16.msra.mxu1 %v2354_v22 }
  0xeb   :  { %1945 = vmatprep.subr.bf16.mxu1 %v2360_v23 }
  0xec   :  { %1924 = vmatpush3.bf16.msra.mxu0 %v2366_v29 }
  0xed   :  { %1925 = vmatprep.subr.bf16.mxu0 %v2372_v30 }
  0xee   :  { %1946 = vmatpush3.bf16.msra.mxu1 %v2378_v38 }
  0xef   :  { %1947 = vmatprep.subr.bf16.mxu1 %v2887_v10 }
  0xf0   :  { %1926 = vmatpush3.bf16.msra.mxu0 %v2888_v11 }
  0xf1   :  { %1927 = vmatprep.subr.bf16.mxu0 %v2889_v12 }
  0xf2   :  { %1948 = vmatpush3.bf16.msra.mxu1 %v2877_v24 }
  0xf3   :  { %1949 = vmatprep.subr.bf16.mxu1 %v2890_v13 }
  0xf4   :  { %1928 = vmatpush3.bf16.msra.mxu0 %v2891_v14 }
  0xf5   :  { %1929 = vmatprep.subr.bf16.mxu0 %v2892_v15 }
  0xf6   :  { %1950 = vmatpush3.bf16.msra.mxu1 %v2893_v16  ;;  %v1627_v17 = vpop.f32.mrb[0].mxu0 }
  0xf7   :  { %v1628_v18 = vpop.f32.mrb[1].mxu0  ;;  %1951 = vmatprep.subr.bf16.mxu1 %v2894_v19  ;;  %v1649_v20 = vpop.f32.mrb[0].mxu1 }
  0xf8   :  { %v1629_v21 = vadd.f32 %v1628_v18, %v1627_v17  ;;  %v1630_v25 = vpop.f32.mrb[2].mxu0  ;;  %1930 = vmatpush3.bf16.msra.mxu0 %v2883_v40  ;;  %v1650_v26 = vpop.f32.mrb[1].mxu1 }
  0xf9   :  { %v1631_v27 = vpop.f32.mrb[3].mxu0  ;;  %1931 = vmatprep.subr.bf16.mxu0 %v2870_v42  ;;  %v1651_v28 = vadd.f32 %v1650_v26, %v1649_v20  ;;  %v1652_v31 = vpop.f32.mrb[2].mxu1 }
  0xfa   :  { %1952 = vmatpush3.bf16.msra.mxu1 %v2871_v51  ;;  %v1653_v32 = vpop.f32.mrb[3].mxu1 }
  0xfb   :  { %1953 = vmatprep.subr.bf16.mxu1 %v2895_v33  ;;  %v662_v34 = vadd.f32 %v1651_v28, %v1629_v21 }
  0xfc   :  { %1932 = vmatpush3.bf16.msra.mxu0 %v2896_v35 }
  0xfd   :  { %1933 = vmatprep.subr.bf16.mxu0 %v2897_v36 }
  0xfe   :  { %1954 = vmatpush3.bf16.msra.mxu1 %v2875_v54 }
  0xff   :  { %1955 = vmatprep.subr.bf16.mxu1 %v2480_v52 }
 0x100   :  { %1934 = vmatpush3.bf16.msra.mxu0 %v2489_v56 }
 0x102   :  { %1956 = vmatpush3.bf16.msra.mxu1 %v2497_v57 }
 0x103   :  { %1342 = vmatmul.mubr.bf16.vlgmr.msra.gmra.mrb[28].mxu0 %v1225_v37 }
 0x105   :  { %1382 = vmatmul.mubr.bf16.vlgmr.msra.gmra.mrb[28].mxu1 %v1227_v43 }
 0x116   :  { %v1671_v45 = vpop.f32.mrb[4].mxu0 }
 0x117   :  { %v1672_v53 = vpop.f32.mrb[5].mxu0 }
 0x118   :  { %v1693_v55 = vpop.f32.mrb[4].mxu1  ;;  %v1673_v58 = vadd.f32 %v1672_v53, %v1671_v45  ;;  %v1674_v60 = vpop.f32.mrb[6].mxu0 }
 0x119   :  { %v1694_v62 = vpop.f32.mrb[5].mxu1  ;;  %v1675_v63 = vpop.f32.mrb[7].mxu0 }
 0x11a   :  { %v702_v22 = vadd.f32 %v1673_v58, %v662_v34  ;;  %v1695_v23 = vadd.f32 %v1694_v62, %v1693_v55  ;;  %v1696_v29 = vpop.f32.mrb[6].mxu1 }
 0x11b   :  { %v1697_v30 = vpop.f32.mrb[7].mxu1 }
 0x11c   :  { %v2784_v38 = vadd.f32 %v1695_v23, %v702_v22 }
 0x136   :  { %v1715_v39 = vpop.f32.mrb[8].mxu0 }
 0x137   :  { %v1716_v40 = vpop.f32.mrb[9].mxu0 }
 0x138   :  { %v1737_v42 = vpop.f32.mrb[8].mxu1  ;;  %v1717_v52 = vadd.f32 %v1716_v40, %v1715_v39  ;;  %v1718_v56 = vpop.f32.mrb[10].mxu0 }
 0x139   :  { %v1738_v57 = vpop.f32.mrb[9].mxu1  ;;  %v1719_v51 = vpop.f32.mrb[11].mxu0 }
 0x13a   :  { %v1739_v54 = vadd.f32 %v1738_v57, %v1737_v42  ;;  %v1740_v44 = vpop.f32.mrb[10].mxu1 }
 0x13b   :  { %v1741_v47 = vpop.f32.mrb[11].mxu1 }
 0x13c   :  { %v876_v41 = vadd.f32 %v1739_v54, %v1717_v52 }
 0x156   :  { %v1759_v24 = vpop.f32.mrb[12].mxu0 }
 0x157   :  { %v1760_v48 = vpop.f32.mrb[13].mxu0 }
 0x158   :  { %v1781_v59 = vpop.f32.mrb[12].mxu1  ;;  %v1761_v49 = vadd.f32 %v1760_v48, %v1759_v24  ;;  %v1762_v50 = vpop.f32.mrb[14].mxu0 }
 0x159   :  { %v1782_v61 = vpop.f32.mrb[13].mxu1  ;;  %v1763_v46 = vpop.f32.mrb[15].mxu0 }
 0x15a   :  { %v916_v0 = vadd.f32 %v1761_v49, %v876_v41  ;;  %v1783_v1 = vadd.f32 %v1782_v61, %v1781_v59  ;;  %v1784_v2 = vpop.f32.mrb[14].mxu1  ;;  %v1394_v59 = vmul.f32 %v2784_v38, %v2784_v38 }
 0x15b   :  { %v1785_v3 = vpop.f32.mrb[15].mxu1 }
 0x15c   :  { %v2786_v4 = vadd.f32 %v1783_v1, %v916_v0  ;;  %v1395_v50 = vsel %vm1390_vm0, %v1394_v59, 0.0 }
 0x15e   :  { %v1463_v5 = vsub.f32 %v2784_v38, %v2786_v4  ;;  %v1389_v6 = vmul.f32 %v2786_v4, %v2784_v38  ;;  %v1398_v49 = vmul.f32 %v2786_v4, %v2786_v4 }
 0x160   :  { %v1464_v7 = vmul.f32 %v1463_v5, %v1463_v5  ;;  %v2793_v8 = vsel %vm1390_vm0, %v1389_v6, 0.0  ;;  %v1399_v61 = vsel %vm1390_vm0, %v1398_v49, 0.0 }
 0x162   :  { %1466 = vrot.lane.b32.xlu1 %v1464_v7, %s2059_s3 }
 0x166   :  { %1480 = vrot.lane.b32.xlu1 %v1464_v7, %s2060_s6 }
 0x176   :  { %v1803_v9 = vpop.f32.mrb[16].mxu0 }
 0x177   :  { %v1804_v10 = vpop.f32.mrb[17].mxu0 }
 0x178   :  { %v1825_v11 = vpop.f32.mrb[16].mxu1  ;;  %v1805_v12 = vadd.f32 %v1804_v10, %v1803_v9  ;;  %v1806_v13 = vpop.f32.mrb[18].mxu0 }
 0x179   :  { %v1826_v14 = vpop.f32.mrb[17].mxu1  ;;  %v1807_v15 = vpop.f32.mrb[19].mxu0 }
 0x17a   :  { %v1827_v16 = vadd.f32 %v1826_v14, %v1825_v11  ;;  %v1828_v17 = vpop.f32.mrb[18].mxu1 }
 0x17b   :  { %v1829_v18 = vpop.f32.mrb[19].mxu1 }
 0x17c   :  { %v1090_v19 = vadd.f32 %v1827_v16, %v1805_v12 }
 0x196   :  { %v1847_v20 = vpop.f32.mrb[20].mxu0 }
 0x197   :  { %v1848_v21 = vpop.f32.mrb[21].mxu0 }
 0x198   :  { %v1869_v25 = vpop.f32.mrb[20].mxu1  ;;  %v1849_v26 = vadd.f32 %v1848_v21, %v1847_v20  ;;  %v1850_v27 = vpop.f32.mrb[22].mxu0 }
 0x199   :  { %v1870_v28 = vpop.f32.mrb[21].mxu1  ;;  %v1851_v31 = vpop.f32.mrb[23].mxu0 }
 0x19a   :  { %v1130_v32 = vadd.f32 %v1849_v26, %v1090_v19  ;;  %v1871_v33 = vadd.f32 %v1870_v28, %v1869_v25  ;;  %v1872_v34 = vpop.f32.mrb[22].mxu1 }
 0x19b   :  { %v1873_v35 = vpop.f32.mrb[23].mxu1 }
 0x19c   :  { %v1170_v36 = vadd.f32 %v1871_v33, %v1130_v32 }
 0x19e   :  { %v1430_v37 = vmul.f32 %v1170_v36, %v1170_v36 }
 0x1a0   :  { %1432 = vrot.lane.b32.xlu0 %v1430_v37, %s2061_s7 }
 0x1b6   :  { %v1891_v43 = vpop.f32.mrb[24].mxu0 }
 0x1b7   :  { %v1892_v45 = vpop.f32.mrb[25].mxu0 }
 0x1b8   :  { %v1913_v53 = vpop.f32.mrb[24].mxu1  ;;  %v1893_v55 = vadd.f32 %v1892_v45, %v1891_v43  ;;  %v1894_v58 = vpop.f32.mrb[26].mxu0 }
 0x1b9   :  { %v1914_v60 = vpop.f32.mrb[25].mxu1  ;;  %v1895_v62 = vpop.f32.mrb[27].mxu0 }
 0x1ba   :  { %v1915_v63 = vadd.f32 %v1914_v60, %v1913_v53  ;;  %v1916_v22 = vpop.f32.mrb[26].mxu1 }
 0x1bb   :  { %v1917_v23 = vpop.f32.mrb[27].mxu1 }
 0x1bc   :  { %v1304_v29 = vadd.f32 %v1915_v63, %v1893_v55 }
 0x1d4   :  { %v1467_v46 = vpop.permute.xlu1 %1466 }
 0x1d5   :  { %v1470_v0 = vsel %vm1469_vm1, %v1467_v46, 0.0 }
 0x1d6   :  { %v1935_v30 = vpop.f32.mrb[28].mxu0 }
 0x1d7   :  { %v1936_v39 = vpop.f32.mrb[29].mxu0 }
 0x1d8   :  { %v1957_v40 = vpop.f32.mrb[28].mxu1  ;;  %v1937_v42 = vadd.f32 %v1936_v39, %v1935_v30  ;;  %v1938_v52 = vpop.f32.mrb[30].mxu0 }
 0x1d9   :  { %v1958_v56 = vpop.f32.mrb[29].mxu1  ;;  %v1939_v44 = vpop.f32.mrb[31].mxu0 }
 0x1da   :  { %v1344_v57 = vadd.f32 %v1937_v42, %v1304_v29  ;;  %v1959_v51 = vadd.f32 %v1958_v56, %v1957_v40  ;;  %v1960_v54 = vpop.f32.mrb[30].mxu1  ;;  %v1481_v38 = vpop.permute.xlu1 %1480 }
 0x1db   :  { %v1961_v47 = vpop.f32.mrb[31].mxu1 }
 0x1dc   :  { %v1384_v41 = vadd.f32 %v1959_v51, %v1344_v57 }
 0x1de   :  { %v1438_v24 = vmul.f32 %v1384_v41, %v1384_v41  ;;  %v1421_v48 = vmul.f32 %v1384_v41, %v1170_v36 }
 0x1e0   :  { %1440 = vrot.lane.b32.xlu0 %v1438_v24, %s2061_s7  ;;  %1423 = vrot.lane.b32.xlu1 %v1421_v48, %s2061_s7 }
 0x1e4   :  { %1506 = vrot.lane.b32.xlu0 %v1464_v7, %s2062_s8  ;;  %v1483_v7 = vsel %vm1469_vm1, %v1481_v38, 0.0 }
 0x203   :  { %1396 = vadd.xlane.f32.xlu0 %v1395_v50 }
 0x204   :  { %1400 = vadd.xlane.f32.xlu1 %v1399_v61 }
 0x208   :  { %1471 = vadd.xlane.f32.xlu1 %v1470_v0 }
 0x212   :  { %v1433_v1 = vpop.permute.xlu0 %1432 }
 0x213   :  { %v1435_v2 = vsel %vm1426_vm2, %v1433_v1, 0.0 }
 0x214   :  { %1436 = vadd.xlane.f32.xlu0 %v1435_v2 }
 0x252   :  { %v1441_v3 = vpop.permute.xlu0 %1440  ;;  %v1424_v9 = vpop.permute.xlu1 %1423 }
 0x253   :  { %v1443_v5 = vsel %vm1426_vm2, %v1441_v3, 0.0  ;;  %v1427_v10 = vsel %vm1426_vm2, %v1424_v9, 0.0 }
 0x254   :  { %1444 = vadd.xlane.f32.xlu0 %v1443_v5 }
 0x256   :  { %v1507_v4 = vpop.permute.xlu0 %1506 }
 0x257   :  { %v1510_v6 = vsel %vm1509_vm3, %v1507_v4, 0.0 }
 0x258   :  { %1511 = vadd.xlane.f32.xlu1 %v1510_v6  ;;  %1484 = vadd.xlane.f32.xlu0 %v1483_v7 }
 0x25c   :  { %1428 = vadd.xlane.f32.xlu1 %v1427_v10  ;;  %1392 = vadd.xlane.f32.xlu0 %v2793_v8 }
 0x290   :  { %v1397_v11 = vpop.xlane.xlu0 %1396 }
 0x291   :  { %v1401_v12 = vpop.xlane.xlu1 %1400 }
 0x292   :  { %v1402_v13 = vmul.f32 %v1401_v12, %v1397_v11 }
 0x294   :  { %v1403_v14 = vmax.f32 %v1402_v13, 1e-16 }
 0x295   :  { %v1472_v16 = vpop.xlane.xlu1 %1471 }
 0x296   :  { %2048 = vrsqrt.f32 %v1403_v14  ;;  %vm1475_vm5 = vcmp.eq.f32.partialorder %v1472_v16, inf  ;;  %vm1477_vm6 = vcmp.eq.f32.partialorder %v1472_v16, 0.0  ;;  %v1478_v43 = vand.u32 2147483648, %v1472_v16 }
 0x297   :  { %2050 = vrsqrt.f32 %v1472_v16 }
 0x2a0   :  { %v2049_v25 = vpop.eup %2048 }
 0x2a1   :  { %v1437_v15 = vpop.xlane.xlu0 %1436  ;;  %v2051_v8 = vpop.eup %2050 }
 0x2a2   :  { %v1474_v32 = vmul.f32 %v2051_v8, %v1472_v16 }
 0x2a4   :  { %v1476_v55 = vsel %vm1475_vm5, %v1472_v16, %v1474_v32 }
 0x2a5   :  { %v1479_v29 = vsel %vm1477_vm6, %v1478_v43, %v1476_v55 }
 0x2e1   :  { %v1445_v17 = vpop.xlane.xlu0 %1444 }
 0x2e2   :  { %v1446_v18 = vmul.f32 %v1445_v17, %v1437_v15  ;;  %v2898_v15 = vlaneseq }
 0x2e4   :  { %v1447_v19 = vmax.f32 %v1446_v18, 1e-16  ;;  %v1533_v16 = vand.u32 127, %v2898_v15 }
 0x2e5   :  { %v1512_v20 = vpop.xlane.xlu1 %1511  ;;  %v1485_v21 = vpop.xlane.xlu0 %1484 }
 0x2e6   :  { %2052 = vrsqrt.f32 %v1447_v19  ;;  %vm1515_vm7 = vcmp.eq.f32.partialorder %v1512_v20, inf  ;;  %vm1488_vm8 = vcmp.eq.f32.partialorder %v1485_v21, inf  ;;  %v1491_v60 = vand.u32 2147483648, %v1485_v21 }
 0x2e7   :  { %2054 = vrsqrt.f32 %v1512_v20  ;;  %v1518_v63 = vand.u32 2147483648, %v1512_v20  ;;  %vm1490_vm9 = vcmp.eq.f32.partialorder %v1485_v21, 0.0  ;;  %vm1517_vm10 = vcmp.eq.f32.partialorder %v1512_v20, 0.0 }
 0x2e8   :  { %2056 = vrsqrt.f32 %v1485_v21  ;;  %vm1537_vm11 = vcmp.eq.s32.totalorder %v1533_v16, 3  ;;  %vm1536_vm12 = vcmp.eq.s32.totalorder %v1533_v16, 2  ;;  %vm1535_vm13 = vcmp.eq.s32.totalorder %v1533_v16, 1 }
 0x2e9   :  { %v1393_v26 = vpop.xlane.xlu0 %1392  ;;  %v1429_v34 = vpop.xlane.xlu1 %1428  ;;  %vm1534_vm14 = vcmp.eq.s32.totalorder %v1533_v16, 0 }
 0x2ea   :  { %v1405_v27 = vmul.f32 %v2049_v25, %v1393_v26 }
 0x2ec   :  { %v1406_v28 = vsub.f32 1.0, %v1405_v27 }
 0x2ee   :  { %v1408_v31 = vsel %vm1407_vm4, %v1406_v28, 0.0 }
 0x2ef   :  { %1409 = vadd.xlane.f32.xlu0 %v1408_v31 }
 0x2f0   :  { %v2053_v33 = vpop.eup %2052 }
 0x2f1   :  { %v2055_v35 = vpop.eup %2054  ;;  %v1449_v36 = vmul.f32 %v2053_v33, %v1429_v34 }
 0x2f2   :  { %v2057_v37 = vpop.eup %2056  ;;  %v1514_v45 = vmul.f32 %v2055_v35, %v1512_v20 }
 0x2f3   :  { %v1450_v53 = vmax.f32 %v1449_v36, 0.0  ;;  %v1487_v58 = vmul.f32 %v2057_v37, %v1485_v21 }
 0x2f4   :  { %v1516_v62 = vsel %vm1515_vm7, %v1512_v20, %v1514_v45 }
 0x2f5   :  { %v1451_v22 = vsel %vm1407_vm4, %v1450_v53, 0.0  ;;  %v1489_v23 = vsel %vm1488_vm8, %v1485_v21, %v1487_v58  ;;  %v1519_v39 = vsel %vm1517_vm10, %v1518_v63, %v1516_v62 }
 0x2f6   :  { %1452 = vadd.xlane.f32.xlu1 %v1451_v22  ;;  %v1492_v30 = vsel %vm1490_vm9, %v1491_v60, %v1489_v23  ;;  %v1520_v52 = vsel %vm1407_vm4, %v1519_v39, 0.0 }
 0x2f7   :  { %v1493_v40 = vadd.f32 %v1492_v30, %v1479_v29 }
 0x2f9   :  { %v1494_v42 = vsel %vm1407_vm4, %v1493_v40, 0.0 }
 0x2fa   :  { %1495 = vadd.xlane.f32.xlu0 %v1494_v42  ;;  %1521 = vadd.xlane.f32.xlu1 %v1520_v52 }
 0x37c   :  { %v1410_v56 = vpop.xlane.xlu0 %1409 }
 0x37d   :  { %v1411_v57 = vrot.slane %v1410_v56, 4 }
 0x37f   :  { %v1412_v51 = vadd.f32 %v1411_v57, %v1410_v56 }
 0x381   :  { %v1413_v54 = vrot.slane %v1412_v51, 2 }
 0x383   :  { %v1453_v44 = vpop.xlane.xlu1 %1452  ;;  %v1414_v47 = vadd.f32 %v1413_v54, %v1412_v51 }
 0x384   :  { %v1454_v41 = vrot.slane %v1453_v44, 4 }
 0x385   :  { %v1415_v24 = vrot.slane %v1414_v47, 1 }
 0x386   :  { %v1455_v48 = vadd.f32 %v1454_v41, %v1453_v44 }
 0x387   :  { %v1496_v59 = vpop.xlane.xlu0 %1495  ;;  %v1522_v49 = vpop.xlane.xlu1 %1521  ;;  %v1416_v50 = vadd.f32 %v1415_v24, %v1414_v47 }
 0x388   :  { %v1456_v61 = vrot.slane %v1455_v48, 2  ;;  %v1497_v46 = vrot.slane %v1496_v59, 4  ;;  %v1523_v0 = vrot.slane %v1522_v49, 4 }
 0x389   :  { %1963 = vpush %v1416_v50 }
 0x38a   :  { %v1498_v1 = vadd.f32 %v1497_v46, %v1496_v59  ;;  %v1524_v2 = vadd.f32 %v1523_v0, %v1522_v49  ;;  %v1457_v3 = vadd.f32 %v1456_v61, %v1455_v48 }
 0x38c   :  { %v1499_v5 = vrot.slane %v1498_v1, 2  ;;  %v1525_v38 = vrot.slane %v1524_v2, 2  ;;  %v1458_v4 = vrot.slane %v1457_v3, 1 }
 0x38e   :  { %v1500_v6 = vadd.f32 %v1499_v5, %v1498_v1  ;;  %v1526_v7 = vadd.f32 %v1525_v38, %v1524_v2  ;;  %v1459_v9 = vadd.f32 %v1458_v4, %v1457_v3 }
 0x390   :  { %1965 = vpush %v1459_v9  ;;  %v1501_v10 = vrot.slane %v1500_v6, 1  ;;  %v1527_v11 = vrot.slane %v1526_v7, 1 }
 0x392   :  { %v1502_v12 = vadd.f32 %v1501_v10, %v1500_v6  ;;  %v1528_v13 = vadd.f32 %v1527_v11, %v1526_v7 }
 0x394   :  { %1967 = vpush %v1502_v12 }
 0x395   :  { %1969 = vpush %v1528_v13 }
 0x3ba   :  { %s1964_s9 = spop %1963 }
 0x3bb   :  { %v1418_v14 = vstv %s1964_s9 }
 0x3bc   :  { %v1420_v17 = vmul.f32 0.5, %v1418_v14 }
 0x3be   :  { %v1538_v25 = vsel %vm1537_vm11, %v1420_v17, 0.0 }
 0x3c1   :  { %s1966_s10 = spop %1965 }
 0x3c2   :  { %v1461_v18 = vstv %s1966_s10 }
 0x3c3   :  { %v1462_v27 = vmul.f32 0.5, %v1461_v18 }
 0x3c5   :  { %s1968_s11 = spop %1967 }
 0x3c6   :  { %v1504_v19 = vstv %s1968_s11  ;;  %s1970_s12 = spop %1969 }
 0x3c7   :  { %v1505_v20 = vmul.f32 0.5, %v1504_v19  ;;  %v1530_v21 = vstv %s1970_s12 }
 0x3c8   :  { %v1531_v26 = vmul.f32 0.25, %v1530_v21 }
 0x3c9   :  { %v1539_v8 = vsel %vm1536_vm12, %v1505_v20, %v1538_v25 }
 0x3ca   :  { %v1540_v28 = vsel %vm1535_vm13, %v1531_v26, %v1539_v8 }
 0x3cb   :  { %v1541_v31 = vsel %vm1534_vm14, %v1462_v27, %v1540_v28 }
 0x3cc   :  { %1542 = vst [vmem:[%s2816_s5] sm:$0x1] %v1541_v31 }

</bundles_post_ra>
